<compile_context>
chip_gen: v5e
topology: v5e:2x2
jax: 0.10.0
libtpu: 0.0.40
codegen_flags: <defaults>
</compile_context>

<pallas_src>
import jax
import jax.numpy as jnp
from jax.experimental import pallas as pl
from jax.experimental.pallas import tpu as pltpu


# --------------------------------------------------------------------------
# Kernel
# --------------------------------------------------------------------------
def _make_kernel(has_neg):
    def kernel(*refs):
        if has_neg:
            (img_ref, neg_ref, sent_ref,
             wi1, bi1, wi2, bi2,
             ws1, bs1, ws2, bs2, ws3, bs3,
             probs_ref, neg_probs_ref) = refs
        else:
            (img_ref, sent_ref,
             wi1, bi1, wi2, bi2,
             ws1, bs1, ws2, bs2, ws3, bs3,
             probs_ref) = refs
            neg_ref = None
            neg_probs_ref = None

        def dense_tanh(x, w_ref, b_ref):
            # Linear -> Dropout (identity) -> Tanh ; bf16 MXU, f32 accumulation.
            y = jnp.dot(x.astype(jnp.bfloat16), w_ref[...],
                        preferred_element_type=jnp.float32) + b_ref[...]
            return jnp.tanh(y)

        # Sentence branch computed ONCE and shared by pos / neg image branches.
        sent_feat = dense_tanh(
            dense_tanh(dense_tanh(sent_ref[...], ws1, bs1), ws2, bs2), ws3, bs3)

        def branch_probs(x):
            f = dense_tanh(dense_tanh(x, wi1, bi1), wi2, bi2)     # (TM, F)
            # Elementwise product (VPU), aligned transpose (XLU), sublane reduce
            # -> (1, TM) lane-dense row feeding an unmasked dense store.
            prod_t = (f * sent_feat).T                            # (F, TM)
            dots = jnp.sum(prod_t, axis=0, keepdims=True)         # (1, TM)
            return jax.nn.sigmoid(dots)

        probs_ref[...] = branch_probs(img_ref[...])
        if has_neg:
            neg_probs_ref[...] = branch_probs(neg_ref[...])

    return kernel


# --------------------------------------------------------------------------
# Parameter init (PyTorch nn.Linear-style), weights stored in bfloat16
# --------------------------------------------------------------------------
def _linear_params(key, in_size, out_size):
    kw, kb = jax.random.split(key)
    bound = 1.0 / (in_size ** 0.5)
    w = jax.random.uniform(kw, (in_size, out_size), jnp.float32, -bound, bound)
    b = jax.random.uniform(kb, (1, out_size), jnp.float32, -bound, bound)
    return w.astype(jnp.bfloat16), b


def init_cc_nn_params(key, img_enc_size, sent_enc_size,
                      img_layer_sizes, sent_layer_sizes):
    img_sizes = [img_enc_size] + list(img_layer_sizes)
    sent_sizes = [sent_enc_size] + list(sent_layer_sizes)
    assert img_sizes[-1] == sent_sizes[-1], "final feature dims must match"
    params = []
    for ins, outs in zip(img_sizes[:-1], img_sizes[1:]):
        key, sub = jax.random.split(key)
        params.extend(_linear_params(sub, ins, outs))
    for ins, outs in zip(sent_sizes[:-1], sent_sizes[1:]):
        key, sub = jax.random.split(key)
        params.extend(_linear_params(sub, ins, outs))
    return tuple(params)   # (wi1,bi1,wi2,bi2, ws1,bs1,ws2,bs2,ws3,bs3)


# --------------------------------------------------------------------------
# Padding helpers (exact: zero-padded features stay exactly zero through tanh)
# --------------------------------------------------------------------------
def _round_up(n, m):
    return ((n + m - 1) // m) * m


def _pad2d(x, rows, cols):
    r, c = x.shape
    return jnp.pad(x, ((0, rows - r), (0, cols - c)))


def _pad_params(params):
    out = []
    for w, b in zip(params[0::2], params[1::2]):
        k, n = w.shape
        kp, np_ = _round_up(k, 128), _round_up(n, 128)
        out.append(_pad2d(w, kp, np_))
        out.append(_pad2d(b, 1, np_))
    return tuple(out)


def _vmem_limit_bytes(pparams, tm, dip, dsp, has_neg):
    param_bytes = sum(int(p.size) * p.dtype.itemsize for p in pparams)
    act_bytes = 2 * tm * ((2 if has_neg else 1) * dip + dsp) * 4   # double-buffered tiles
    out_bytes = 2 * 2 * tm * 4
    total = 2 * param_bytes + act_bytes + out_bytes + (8 << 20)    # headroom
    return int(min(max(total, 32 << 20), 100 << 20))


# --------------------------------------------------------------------------
# Wrapper
# --------------------------------------------------------------------------
def cc_nn_forward(img, sent, params, neg_img=None, tm=128):
    B = img.shape[0]
    has_neg = neg_img is not None

    pparams = _pad_params(params)
    dip = pparams[0].shape[0]   # padded img input dim   (wi1 rows)
    dsp = pparams[4].shape[0]   # padded sent input dim  (ws1 rows)

    bpad = _round_up(B, tm)
    img_p = _pad2d(img.astype(jnp.float32), bpad, dip)
    sent_p = _pad2d(sent.astype(jnp.float32), bpad, dsp)

    def act_spec(d):
        return pl.BlockSpec((tm, d), lambda i: (i, 0))

    def const_spec(shape):
        return pl.BlockSpec(shape, lambda i: (0, 0))   # VMEM-resident across grid

    out_spec = pl.BlockSpec((1, tm), lambda i: (0, i))  # lane-dense (batch on lanes)

    in_arrays = [img_p]
    in_specs = [act_spec(dip)]
    if has_neg:
        neg_p = _pad2d(neg_img.astype(jnp.float32), bpad, dip)
        in_arrays.append(neg_p)
        in_specs.append(act_spec(dip))
    in_arrays.append(sent_p)
    in_specs.append(act_spec(dsp))
    for p in pparams:
        in_arrays.append(p)
        in_specs.append(const_spec(p.shape))

    n_out = 2 if has_neg else 1
    out_shape = tuple(jax.ShapeDtypeStruct((1, bpad), jnp.float32)
                      for _ in range(n_out))
    out_specs = tuple(out_spec for _ in range(n_out))

    grid = (bpad // tm,)
    vmem_bytes = _vmem_limit_bytes(pparams, tm, dip, dsp, has_neg)

    outs = pl.pallas_call(
        _make_kernel(has_neg),
        out_shape=out_shape,
        grid_spec=pltpu.PrefetchScalarGridSpec(
            num_scalar_prefetch=0,
            grid=grid,
            in_specs=in_specs,
            out_specs=out_specs,
        ),
        compiler_params=pltpu.CompilerParams(
            dimension_semantics=("parallel",),
            vmem_limit_bytes=vmem_bytes,
        ),
    )(*in_arrays)

    probs = outs[0][0, :B]
    if has_neg:
        neg_probs = outs[1][0, :B]
    else:
        neg_probs = jnp.zeros_like(probs)
    return probs, neg_probs


# --------------------------------------------------------------------------
# Test
# --------------------------------------------------------------------------
if __name__ == "__main__":
    # Small, deliberately non-128-aligned sizes to exercise the padding path
    # (stand-ins for the module defaults [250, 200] / [2000, 500, 200]).
    B = 8
    img_enc_size, sent_enc_size = 100, 120
    img_layer_sizes = [96, 64]
    sent_layer_sizes = [160, 96, 64]

    key = jax.random.PRNGKey(0)
    kp, ki, ks, kn = jax.random.split(key, 4)

    params = init_cc_nn_params(kp, img_enc_size, sent_enc_size,
                               img_layer_sizes, sent_layer_sizes)
    img = jax.random.normal(ki, (B, img_enc_size), jnp.float32)
    sent = jax.random.normal(ks, (B, sent_enc_size), jnp.float32)
    neg = jax.random.normal(kn, (B, img_enc_size), jnp.float32)

    # Fused positive + negative pass (one pallas_call), and the no-neg path.
    probs, neg_probs = cc_nn_forward(img, sent, params, neg_img=neg)
    probs0, neg0 = cc_nn_forward(img, sent, params)
    jax.block_until_ready((probs, neg_probs, probs0, neg0))

    # Pure-JAX f32 reference (weights upcast); kernel uses bf16 weights/acts,
    # so compare with a bf16-appropriate tolerance.
    def ref_forward(img_x, sent_x, p):
        wi1, bi1, wi2, bi2, ws1, bs1, ws2, bs2, ws3, bs3 = [
            a.astype(jnp.float32) for a in p]
        f = jnp.tanh(jnp.tanh(img_x @ wi1 + bi1) @ wi2 + bi2)
        s = jnp.tanh(jnp.tanh(jnp.tanh(sent_x @ ws1 + bs1) @ ws2 + bs2) @ ws3 + bs3)
        return jax.nn.sigmoid(jnp.sum(f * s, axis=1))

    ref_p = ref_forward(img, sent, params)
    ref_n = ref_forward(neg, sent, params)

    assert probs.shape == (B,) and neg_probs.shape == (B,)
    assert jnp.allclose(probs, ref_p, atol=2e-2, rtol=2e-2)
    assert jnp.allclose(neg_probs, ref_n, atol=2e-2, rtol=2e-2)
    assert jnp.allclose(probs0, ref_p, atol=2e-2, rtol=2e-2)
    assert jnp.all(neg0 == 0.0)
    print("KERNEL_OK")
</pallas_src>

<mosaic_0001>
module attributes {stable_mosaic.version = 11 : i64} {
  func.func @kernel(%arg0: i32, %arg1: memref<128x128xf32, #tpu.memory_space<vmem>>, %arg2: memref<128x128xf32, #tpu.memory_space<vmem>>, %arg3: memref<128x128xf32, #tpu.memory_space<vmem>>, %arg4: memref<128x128xbf16, #tpu.memory_space<vmem>>, %arg5: memref<1x128xf32, #tpu.memory_space<vmem>>, %arg6: memref<128x128xbf16, #tpu.memory_space<vmem>>, %arg7: memref<1x128xf32, #tpu.memory_space<vmem>>, %arg8: memref<128x256xbf16, #tpu.memory_space<vmem>>, %arg9: memref<1x256xf32, #tpu.memory_space<vmem>>, %arg10: memref<256x128xbf16, #tpu.memory_space<vmem>>, %arg11: memref<1x128xf32, #tpu.memory_space<vmem>>, %arg12: memref<128x128xbf16, #tpu.memory_space<vmem>>, %arg13: memref<1x128xf32, #tpu.memory_space<vmem>>, %arg14: memref<1x128xf32, #tpu.memory_space<vmem>>, %arg15: memref<1x128xf32, #tpu.memory_space<vmem>>) attributes {dimension_semantics = [#tpu.dimension_semantics<parallel>], iteration_bounds = array<i64: 1>, scalar_prefetch = 0 : i64, scratch_operands = 0 : i64, tpu.core_type = #tpu.core_type<tc>, window_params = [{transform_indices = @transform_0, window_bounds = array<i64: 128, 128>}, {transform_indices = @transform_1, window_bounds = array<i64: 128, 128>}, {transform_indices = @transform_2, window_bounds = array<i64: 128, 128>}, {pipeline_mode = #tpu.pipeline_mode<synchronous>, transform_indices = @transform_3, window_bounds = array<i64: 128, 128>}, {pipeline_mode = #tpu.pipeline_mode<synchronous>, transform_indices = @transform_4, window_bounds = array<i64: 1, 128>}, {pipeline_mode = #tpu.pipeline_mode<synchronous>, transform_indices = @transform_5, window_bounds = array<i64: 128, 128>}, {pipeline_mode = #tpu.pipeline_mode<synchronous>, transform_indices = @transform_6, window_bounds = array<i64: 1, 128>}, {pipeline_mode = #tpu.pipeline_mode<synchronous>, transform_indices = @transform_7, window_bounds = array<i64: 128, 256>}, {pipeline_mode = #tpu.pipeline_mode<synchronous>, transform_indices = @transform_8, window_bounds = array<i64: 1, 256>}, {pipeline_mode = #tpu.pipeline_mode<synchronous>, transform_indices = @transform_9, window_bounds = array<i64: 256, 128>}, {pipeline_mode = #tpu.pipeline_mode<synchronous>, transform_indices = @transform_10, window_bounds = array<i64: 1, 128>}, {pipeline_mode = #tpu.pipeline_mode<synchronous>, transform_indices = @transform_11, window_bounds = array<i64: 128, 128>}, {pipeline_mode = #tpu.pipeline_mode<synchronous>, transform_indices = @transform_12, window_bounds = array<i64: 1, 128>}, {transform_indices = @transform_13, window_bounds = array<i64: 1, 128>}, {transform_indices = @transform_14, window_bounds = array<i64: 1, 128>}]} {
    %c0 = arith.constant 0 : index
    %c0_0 = arith.constant 0 : index
    %0 = vector.load %arg3[%c0, %c0_0] : memref<128x128xf32, #tpu.memory_space<vmem>>, vector<128x128xf32>
    %1 = arith.truncf %0 : vector<128x128xf32> to vector<128x128xbf16>
    %c0_1 = arith.constant 0 : index
    %c0_2 = arith.constant 0 : index
    %2 = vector.load %arg8[%c0_1, %c0_2] : memref<128x256xbf16, #tpu.memory_space<vmem>>, vector<128x256xbf16>
    %cst = arith.constant dense<0.000000e+00> : vector<128x256xf32>
    %3 = tpu.matmul %1, %2, %cst {dimension_numbers = #tpu.dot_dimension_numbers<[1], [0], [0], [1], [0, 0, 1, 1], [], []>} : vector<128x128xbf16>, vector<128x256xbf16>, vector<128x256xf32> -> vector<128x256xf32>
    %c0_3 = arith.constant 0 : index
    %c0_4 = arith.constant 0 : index
    %4 = vector.load %arg9[%c0_3, %c0_4] : memref<1x256xf32, #tpu.memory_space<vmem>>, vector<1x256xf32>
    %5 = vector.broadcast %4 : vector<1x256xf32> to vector<128x256xf32>
    %6 = arith.addf %3, %5 : vector<128x256xf32>
    %7 = math.tanh %6 : vector<128x256xf32>
    %8 = arith.truncf %7 : vector<128x256xf32> to vector<128x256xbf16>
    %c0_5 = arith.constant 0 : index
    %c0_6 = arith.constant 0 : index
    %9 = vector.load %arg10[%c0_5, %c0_6] : memref<256x128xbf16, #tpu.memory_space<vmem>>, vector<256x128xbf16>
    %cst_7 = arith.constant dense<0.000000e+00> : vector<128x128xf32>
    %10 = tpu.matmul %8, %9, %cst_7 {dimension_numbers = #tpu.dot_dimension_numbers<[1], [0], [0], [1], [0, 0, 1, 1], [], []>} : vector<128x256xbf16>, vector<256x128xbf16>, vector<128x128xf32> -> vector<128x128xf32>
    %c0_8 = arith.constant 0 : index
    %c0_9 = arith.constant 0 : index
    %11 = vector.load %arg11[%c0_8, %c0_9] : memref<1x128xf32, #tpu.memory_space<vmem>>, vector<1x128xf32>
    %12 = vector.broadcast %11 : vector<1x128xf32> to vector<128x128xf32>
    %13 = arith.addf %10, %12 : vector<128x128xf32>
    %14 = math.tanh %13 : vector<128x128xf32>
    %15 = arith.truncf %14 : vector<128x128xf32> to vector<128x128xbf16>
    %c0_10 = arith.constant 0 : index
    %c0_11 = arith.constant 0 : index
    %16 = vector.load %arg12[%c0_10, %c0_11] : memref<128x128xbf16, #tpu.memory_space<vmem>>, vector<128x128xbf16>
    %cst_12 = arith.constant dense<0.000000e+00> : vector<128x128xf32>
    %17 = tpu.matmul %15, %16, %cst_12 {dimension_numbers = #tpu.dot_dimension_numbers<[1], [0], [0], [1], [0, 0, 1, 1], [], []>} : vector<128x128xbf16>, vector<128x128xbf16>, vector<128x128xf32> -> vector<128x128xf32>
    %c0_13 = arith.constant 0 : index
    %c0_14 = arith.constant 0 : index
    %18 = vector.load %arg13[%c0_13, %c0_14] : memref<1x128xf32, #tpu.memory_space<vmem>>, vector<1x128xf32>
    %19 = vector.broadcast %18 : vector<1x128xf32> to vector<128x128xf32>
    %20 = arith.addf %17, %19 : vector<128x128xf32>
    %21 = math.tanh %20 : vector<128x128xf32>
    %c0_15 = arith.constant 0 : index
    %c0_16 = arith.constant 0 : index
    %22 = vector.load %arg1[%c0_15, %c0_16] : memref<128x128xf32, #tpu.memory_space<vmem>>, vector<128x128xf32>
    %23 = arith.truncf %22 : vector<128x128xf32> to vector<128x128xbf16>
    %c0_17 = arith.constant 0 : index
    %c0_18 = arith.constant 0 : index
    %24 = vector.load %arg4[%c0_17, %c0_18] : memref<128x128xbf16, #tpu.memory_space<vmem>>, vector<128x128xbf16>
    %cst_19 = arith.constant dense<0.000000e+00> : vector<128x128xf32>
    %25 = tpu.matmul %23, %24, %cst_19 {dimension_numbers = #tpu.dot_dimension_numbers<[1], [0], [0], [1], [0, 0, 1, 1], [], []>} : vector<128x128xbf16>, vector<128x128xbf16>, vector<128x128xf32> -> vector<128x128xf32>
    %c0_20 = arith.constant 0 : index
    %c0_21 = arith.constant 0 : index
    %26 = vector.load %arg5[%c0_20, %c0_21] : memref<1x128xf32, #tpu.memory_space<vmem>>, vector<1x128xf32>
    %27 = vector.broadcast %26 : vector<1x128xf32> to vector<128x128xf32>
    %28 = arith.addf %25, %27 : vector<128x128xf32>
    %29 = math.tanh %28 : vector<128x128xf32>
    %30 = arith.truncf %29 : vector<128x128xf32> to vector<128x128xbf16>
    %c0_22 = arith.constant 0 : index
    %c0_23 = arith.constant 0 : index
    %31 = vector.load %arg6[%c0_22, %c0_23] : memref<128x128xbf16, #tpu.memory_space<vmem>>, vector<128x128xbf16>
    %cst_24 = arith.constant dense<0.000000e+00> : vector<128x128xf32>
    %32 = tpu.matmul %30, %31, %cst_24 {dimension_numbers = #tpu.dot_dimension_numbers<[1], [0], [0], [1], [0, 0, 1, 1], [], []>} : vector<128x128xbf16>, vector<128x128xbf16>, vector<128x128xf32> -> vector<128x128xf32>
    %c0_25 = arith.constant 0 : index
    %c0_26 = arith.constant 0 : index
    %33 = vector.load %arg7[%c0_25, %c0_26] : memref<1x128xf32, #tpu.memory_space<vmem>>, vector<1x128xf32>
    %34 = vector.broadcast %33 : vector<1x128xf32> to vector<128x128xf32>
    %35 = arith.addf %32, %34 : vector<128x128xf32>
    %36 = math.tanh %35 : vector<128x128xf32>
    %37 = arith.mulf %36, %21 : vector<128x128xf32>
    %38 = tpu.transpose %37, [1, 0] : vector<128x128xf32> -> vector<128x128xf32>
    %cst_27 = arith.constant dense<0.000000e+00> : vector<128xf32>
    %39 = vector.multi_reduction <add>, %38, %cst_27 [0] : vector<128x128xf32> to vector<128xf32>
    %40 = vector.shape_cast %39 : vector<128xf32> to vector<1x128xf32>
    %41 = arith.negf %40 : vector<1x128xf32>
    %42 = math.exp %41 : vector<1x128xf32>
    %cst_28 = arith.constant 1.000000e+00 : f32
    %43 = vector.broadcast %cst_28 : f32 to vector<1x128xf32>
    %44 = arith.addf %43, %42 : vector<1x128xf32>
    %45 = arith.divf %43, %44 : vector<1x128xf32>
    %c0_29 = arith.constant 0 : index
    %c0_30 = arith.constant 0 : index
    %46 = vector.load %arg14[%c0_29, %c0_30] : memref<1x128xf32, #tpu.memory_space<vmem>>, vector<1x128xf32>
    tpu.vector_store %arg14[%c0_29, %c0_30], %45 {strides = array<i32>} : memref<1x128xf32, #tpu.memory_space<vmem>>, vector<1x128xf32>,
    %c0_31 = arith.constant 0 : index
    %c0_32 = arith.constant 0 : index
    %47 = vector.load %arg2[%c0_31, %c0_32] : memref<128x128xf32, #tpu.memory_space<vmem>>, vector<128x128xf32>
    %48 = arith.truncf %47 : vector<128x128xf32> to vector<128x128xbf16>
    %c0_33 = arith.constant 0 : index
    %c0_34 = arith.constant 0 : index
    %49 = vector.load %arg4[%c0_33, %c0_34] : memref<128x128xbf16, #tpu.memory_space<vmem>>, vector<128x128xbf16>
    %cst_35 = arith.constant dense<0.000000e+00> : vector<128x128xf32>
    %50 = tpu.matmul %48, %49, %cst_35 {dimension_numbers = #tpu.dot_dimension_numbers<[1], [0], [0], [1], [0, 0, 1, 1], [], []>} : vector<128x128xbf16>, vector<128x128xbf16>, vector<128x128xf32> -> vector<128x128xf32>
    %c0_36 = arith.constant 0 : index
    %c0_37 = arith.constant 0 : index
    %51 = vector.load %arg5[%c0_36, %c0_37] : memref<1x128xf32, #tpu.memory_space<vmem>>, vector<1x128xf32>
    %52 = vector.broadcast %51 : vector<1x128xf32> to vector<128x128xf32>
    %53 = arith.addf %50, %52 : vector<128x128xf32>
    %54 = math.tanh %53 : vector<128x128xf32>
    %55 = arith.truncf %54 : vector<128x128xf32> to vector<128x128xbf16>
    %c0_38 = arith.constant 0 : index
    %c0_39 = arith.constant 0 : index
    %56 = vector.load %arg6[%c0_38, %c0_39] : memref<128x128xbf16, #tpu.memory_space<vmem>>, vector<128x128xbf16>
    %cst_40 = arith.constant dense<0.000000e+00> : vector<128x128xf32>
    %57 = tpu.matmul %55, %56, %cst_40 {dimension_numbers = #tpu.dot_dimension_numbers<[1], [0], [0], [1], [0, 0, 1, 1], [], []>} : vector<128x128xbf16>, vector<128x128xbf16>, vector<128x128xf32> -> vector<128x128xf32>
    %c0_41 = arith.constant 0 : index
    %c0_42 = arith.constant 0 : index
    %58 = vector.load %arg7[%c0_41, %c0_42] : memref<1x128xf32, #tpu.memory_space<vmem>>, vector<1x128xf32>
    %59 = vector.broadcast %58 : vector<1x128xf32> to vector<128x128xf32>
    %60 = arith.addf %57, %59 : vector<128x128xf32>
    %61 = math.tanh %60 : vector<128x128xf32>
    %62 = arith.mulf %61, %21 : vector<128x128xf32>
    %63 = tpu.transpose %62, [1, 0] : vector<128x128xf32> -> vector<128x128xf32>
    %cst_43 = arith.constant dense<0.000000e+00> : vector<128xf32>
    %64 = vector.multi_reduction <add>, %63, %cst_43 [0] : vector<128x128xf32> to vector<128xf32>
    %65 = vector.shape_cast %64 : vector<128xf32> to vector<1x128xf32>
    %66 = arith.negf %65 : vector<1x128xf32>
    %67 = math.exp %66 : vector<1x128xf32>
    %cst_44 = arith.constant 1.000000e+00 : f32
    %68 = vector.broadcast %cst_44 : f32 to vector<1x128xf32>
    %69 = arith.addf %68, %67 : vector<1x128xf32>
    %70 = arith.divf %68, %69 : vector<1x128xf32>
    %c0_45 = arith.constant 0 : index
    %c0_46 = arith.constant 0 : index
    %71 = vector.load %arg15[%c0_45, %c0_46] : memref<1x128xf32, #tpu.memory_space<vmem>>, vector<1x128xf32>
    tpu.vector_store %arg15[%c0_45, %c0_46], %70 {strides = array<i32>} : memref<1x128xf32, #tpu.memory_space<vmem>>, vector<1x128xf32>,
    return
  }
  func.func @transform_0(%arg0: i32) -> (i32, i32) {
    %c0_i32 = arith.constant 0 : i32
    %c0_i32_0 = arith.constant 0 : i32
    return %arg0, %c0_i32 : i32, i32
  }
  func.func @transform_1(%arg0: i32) -> (i32, i32) {
    %c0_i32 = arith.constant 0 : i32
    %c0_i32_0 = arith.constant 0 : i32
    return %arg0, %c0_i32 : i32, i32
  }
  func.func @transform_2(%arg0: i32) -> (i32, i32) {
    %c0_i32 = arith.constant 0 : i32
    %c0_i32_0 = arith.constant 0 : i32
    return %arg0, %c0_i32 : i32, i32
  }
  func.func @transform_3(%arg0: i32) -> (i32, i32) {
    %c0_i32 = arith.constant 0 : i32
    %c0_i32_0 = arith.constant 0 : i32
    %c0_i32_1 = arith.constant 0 : i32
    return %c0_i32, %c0_i32_0 : i32, i32
  }
  func.func @transform_4(%arg0: i32) -> (i32, i32) {
    %c0_i32 = arith.constant 0 : i32
    %c0_i32_0 = arith.constant 0 : i32
    %c0_i32_1 = arith.constant 0 : i32
    return %c0_i32, %c0_i32_0 : i32, i32
  }
  func.func @transform_5(%arg0: i32) -> (i32, i32) {
    %c0_i32 = arith.constant 0 : i32
    %c0_i32_0 = arith.constant 0 : i32
    %c0_i32_1 = arith.constant 0 : i32
    return %c0_i32, %c0_i32_0 : i32, i32
  }
  func.func @transform_6(%arg0: i32) -> (i32, i32) {
    %c0_i32 = arith.constant 0 : i32
    %c0_i32_0 = arith.constant 0 : i32
    %c0_i32_1 = arith.constant 0 : i32
    return %c0_i32, %c0_i32_0 : i32, i32
  }
  func.func @transform_7(%arg0: i32) -> (i32, i32) {
    %c0_i32 = arith.constant 0 : i32
    %c0_i32_0 = arith.constant 0 : i32
    %c0_i32_1 = arith.constant 0 : i32
    return %c0_i32, %c0_i32_0 : i32, i32
  }
  func.func @transform_8(%arg0: i32) -> (i32, i32) {
    %c0_i32 = arith.constant 0 : i32
    %c0_i32_0 = arith.constant 0 : i32
    %c0_i32_1 = arith.constant 0 : i32
    return %c0_i32, %c0_i32_0 : i32, i32
  }
  func.func @transform_9(%arg0: i32) -> (i32, i32) {
    %c0_i32 = arith.constant 0 : i32
    %c0_i32_0 = arith.constant 0 : i32
    %c0_i32_1 = arith.constant 0 : i32
    return %c0_i32, %c0_i32_0 : i32, i32
  }
  func.func @transform_10(%arg0: i32) -> (i32, i32) {
    %c0_i32 = arith.constant 0 : i32
    %c0_i32_0 = arith.constant 0 : i32
    %c0_i32_1 = arith.constant 0 : i32
    return %c0_i32, %c0_i32_0 : i32, i32
  }
  func.func @transform_11(%arg0: i32) -> (i32, i32) {
    %c0_i32 = arith.constant 0 : i32
    %c0_i32_0 = arith.constant 0 : i32
    %c0_i32_1 = arith.constant 0 : i32
    return %c0_i32, %c0_i32_0 : i32, i32
  }
  func.func @transform_12(%arg0: i32) -> (i32, i32) {
    %c0_i32 = arith.constant 0 : i32
    %c0_i32_0 = arith.constant 0 : i32
    %c0_i32_1 = arith.constant 0 : i32
    return %c0_i32, %c0_i32_0 : i32, i32
  }
  func.func @transform_13(%arg0: i32) -> (i32, i32) {
    %c0_i32 = arith.constant 0 : i32
    %c0_i32_0 = arith.constant 0 : i32
    return %c0_i32, %arg0 : i32, i32
  }
  func.func @transform_14(%arg0: i32) -> (i32, i32) {
    %c0_i32 = arith.constant 0 : i32
    %c0_i32_0 = arith.constant 0 : i32
    return %c0_i32, %arg0 : i32, i32
  }
}

</mosaic_0001>

<bundles_post_ra>
// kernel: tpu_custom_call.1
= control target key start
LH: loop header
LB: loop body
LE: loop exit
PB: predicated region body
PF: predicated region fallthrough
CT: control target
= control target key end

     0   :  { %20 = vsyncpa [#allocation3], 0  ;;  %s2943_s0 = inlined_call_operand.hbm [shape: f32[128,128], index: 0, kind: input, shape index: {}]   ;;  %s2944_s1 = inlined_call_operand.hbm [shape: f32[128,128], index: 1, kind: input, shape index: {}]   ;;  %s2945_s2 = inlined_call_operand.hbm [shape: f32[128,128], index: 2, kind: input, shape index: {}]   ;;  %s2946_s3 = inlined_call_operand.hbm [shape: bf16[128,128], index: 3, kind: input, shape index: {}]   ;;  %s2947_s4 = inlined_call_operand.vmem [shape: f32[1,128], index: 4, kind: input, shape index: {}]   ;;  %s2948_s5 = inlined_call_operand.hbm [shape: bf16[128,128], index: 5, kind: input, shape index: {}]   ;;  %s2949_s6 = inlined_call_operand.vmem [shape: f32[1,128], index: 6, kind: input, shape index: {}]   ;;  %s2950_s7 = inlined_call_operand.hbm [shape: bf16[128,256], index: 7, kind: input, shape index: {}]   ;;  %s2951_s8 = inlined_call_operand.vmem [shape: f32[1,256], index: 8, kind: input, shape index: {}]   ;;  %s2952_s9 = inlined_call_operand.hbm [shape: bf16[256,128], index: 9, kind: input, shape index: {}]   ;;  %s2953_s10 = inlined_call_operand.vmem [shape: f32[1,128], index: 10, kind: input, shape index: {}]   ;;  %s2954_s11 = inlined_call_operand.hbm [shape: bf16[128,128], index: 11, kind: input, shape index: {}]   ;;  %s2955_s12 = inlined_call_operand.vmem [shape: f32[1,128], index: 12, kind: input, shape index: {}]   ;;  %s2956_s13 = inlined_call_operand.hbm [shape: f32[1,128], index: 13, kind: output, shape index: {0}]   ;;  %s2957_s14 = inlined_call_operand.hbm [shape: f32[1,128], index: 14, kind: output, shape index: {1}]  }
   0x1   :  { %21 = vsyncpa [#allocation6], 0 }
   0x2   :  { %22 = vsyncpa [#allocation9], 0 }
   0x3   :  { %23 = vsyncpa [#allocation12], 0 }
   0x4   :  { %24 = vsyncpa [#allocation15], 0 }
   0x5   :  { %25 = vsyncpa [#allocation4], 0 }
   0x6   :  { %26 = vsyncpa [#allocation18], 0  ;;  %s44_s15 = sshll.u32 %s2944_s1, 4  ;;  %s2567_s16 = smov [#allocation5]   ;;  %s45_s15 = int_to_ptr.hbm [resolvable:$true] %s44_s15 }
   0x7   :  { %s46_s17 = sshll.u32 %s2567_s16, 4  ;;  %s70_s20 = sshll.u32 %s2946_s3, 4  ;;  %s47_s17 = int_to_ptr.vmem [resolvable:$true] %s46_s17  ;;  %s71_s20 = int_to_ptr.hbm [resolvable:$true] %s70_s20 }
   0x8   :  { %s2568_s21 = smov 128   ;;  %s2569_s22 = smov 8  }
   0x9   :  { %52 = dma.hbm_to_vmem [thread:$0]  %s45_s15, 2048, %s47_s17, [#allocation6], %s2568_s21, %s2568_s21, %s2569_s22  }
   0xa   :  { %s2570_s23 = smov [#allocation8]   ;;  %s2571_s25 = smov 64  }
   0xb   :  { %s72_s24 = sshll.u32 %s2570_s23, 4  ;;  %s2572_s1 = smov 4   ;;  %s73_s24 = int_to_ptr.vmem [resolvable:$true] %s72_s24 }
   0xc   :  { %78 = dma.hbm_to_vmem [thread:$0]  %s71_s20, 1024, %s73_s24, [#allocation9], %s2571_s25, %s2571_s25, %s2572_s1  }
   0xd   :  { %s100_s3 = sshll.u32 %s2950_s7, 4  ;;  %s2573_s28 = smov [#allocation11]   ;;  %s101_s3 = int_to_ptr.hbm [resolvable:$true] %s100_s3 }
   0xe   :  { %s102_s29 = sshll.u32 %s2573_s28, 4  ;;  %s31_s16 = sshll.u32 %s2943_s0, 4  ;;  %s103_s29 = int_to_ptr.vmem [resolvable:$true] %s102_s29  ;;  %s32_s16 = int_to_ptr.hbm [resolvable:$true] %s31_s16 }
   0xf   :  { %108 = dma.hbm_to_vmem [thread:$0]  %s101_s3, 2048, %s103_s29, [#allocation12], %s2568_s21, %s2568_s21, %s2569_s22  }
  0x10   :  { %s2574_s17 = smov [#allocation2]   ;;  %s57_s23 = sshll.u32 %s2945_s2, 4  ;;  %s58_s23 = int_to_ptr.hbm [resolvable:$true] %s57_s23 }
  0x11   :  { %s33_s18 = sshll.u32 %s2574_s17, 4  ;;  %s85_s0 = sshll.u32 %s2948_s5, 4  ;;  %s34_s18 = int_to_ptr.vmem [resolvable:$true] %s33_s18  ;;  %s86_s0 = int_to_ptr.hbm [resolvable:$true] %s85_s0 }
  0x12   :  { %39 = dma.hbm_to_vmem [thread:$0]  %s32_s16, 2048, %s34_s18, [#allocation3], %s2568_s21, %s2568_s21, %s2569_s22  }
  0x13   :  { %s2575_s26 = smov [#allocation7]   ;;  %s2576_s3 = smov [#allocation10]  }
  0x14   :  { %s59_s27 = sshll.u32 %s2575_s26, 4  ;;  %s87_s2 = sshll.u32 %s2576_s3, 4  ;;  %s60_s27 = int_to_ptr.vmem [resolvable:$true] %s59_s27  ;;  %s88_s2 = int_to_ptr.vmem [resolvable:$true] %s87_s2 }
  0x15   :  { %65 = dma.hbm_to_vmem [thread:$0]  %s58_s23, 2048, %s60_s27, [#allocation6], %s2568_s21, %s2568_s21, %s2569_s22  }
  0x16   :  { %s115_s30 = sshll.u32 %s2952_s9, 4  ;;  %s130_s16 = sshll.u32 %s2954_s11, 4  ;;  %s116_s30 = int_to_ptr.hbm [resolvable:$true] %s115_s30  ;;  %s131_s16 = int_to_ptr.hbm [resolvable:$true] %s130_s16 }
  0x17   :  { %93 = dma.hbm_to_vmem [thread:$0]  %s86_s0, 1024, %s88_s2, [#allocation9], %s2571_s25, %s2571_s25, %s2572_s1  }
  0x18   :  { %s2577_s17 = smov [#allocation13]   ;;  %s2578_s21 = smov [#allocation14]  }
  0x19   :  { %s117_s18 = sshll.u32 %s2577_s17, 4  ;;  %s132_s9 = sshll.u32 %s2578_s21, 4  ;;  %s118_s18 = int_to_ptr.vmem [resolvable:$true] %s117_s18  ;;  %s133_s9 = int_to_ptr.vmem [resolvable:$true] %s132_s9 }
  0x1a   :  { %123 = dma.hbm_to_vmem [thread:$0]  %s116_s30, 2048, %s118_s18, [#allocation12], %s2571_s25, %s2571_s25, %s2572_s1  }
  0x1b   :  { %138 = dma.hbm_to_vmem [thread:$0]  %s131_s16, 1024, %s133_s9, [#allocation15], %s2571_s25, %s2571_s25, %s2572_s1  }
  0x1c   :  { %2553 = dma.done.wait [#allocation3], 2048  }
  0x1d   :  { %2554 = vsyncadd [#allocation3], 4294965248 }
  0x1e   :  { %2555 = dma.done.wait [#allocation6], 4096  }
  0x1f   :  { %2556 = vsyncadd [#allocation6], 4294963200 }
  0x20   :  { %2557 = dma.done.wait [#allocation9], 2048  }
  0x21   :  { %2558 = vsyncadd [#allocation9], 4294965248 }
  0x22   :  { %2559 = dma.done.wait [#allocation12], 4096  }
  0x23   :  { %2560 = vsyncadd [#allocation12], 4294963200 }
  0x24   :  { %2561 = dma.done.wait [#allocation15], 1024  }
  0x25   :  { %2562 = vsyncadd [#allocation15], 4294966272  ;;  %v1701_v0 = vld [vmem:[#allocation11 + $0x70] sm:$0xf]  ;;  %v1948_v1 = vld [vmem:[#allocation11 + $0x74] sm:$0xf0] }
  0x26   :  { %v1693_v2 = vld [vmem:[#allocation11 + $0x60] sm:$0xf]  ;;  %v1702_v3 = vor.u32 %v1948_v1, %v1701_v0  ;;  %v1946_v4 = vld [vmem:[#allocation11 + $0x64] sm:$0xf0]  ;;  %v1685_v6 = vld [vmem:[#allocation11 + $0x50] sm:$0xf] }
  0x27   :  { %v1694_v5 = vor.u32 %v1946_v4, %v1693_v2  ;;  %v1944_v7 = vld [vmem:[#allocation11 + $0x54] sm:$0xf0]  ;;  %v1677_v9 = vld [vmem:[#allocation11 + $0x40] sm:$0xf]  ;;  %v1942_v10 = vld [vmem:[#allocation11 + $0x44] sm:$0xf0] }
  0x28   :  { %299 = vmatpush.bf16.msra.mxu0 %v1702_v3  ;;  %2005 = vmatpush.bf16.msra.mxu1 %v1702_v3  ;;  %v1686_v8 = vor.u32 %v1944_v7, %v1685_v6  ;;  %v1678_v11 = vor.u32 %v1942_v10, %v1677_v9  ;;  %v1669_v12 = vld [vmem:[#allocation11 + $0x30] sm:$0xf]  ;;  %v1940_v13 = vld [vmem:[#allocation11 + $0x34] sm:$0xf0]  ;;  %v1661_v15 = vld [vmem:[#allocation11 + $0x20] sm:$0xf] }
  0x29   :  { %2006 = vmatpush.bf16.msra.mxu2 %v1702_v3  ;;  %2007 = vmatpush.bf16.msra.mxu3 %v1702_v3  ;;  %v1670_v14 = vor.u32 %v1940_v13, %v1669_v12  ;;  %v1938_v16 = vld [vmem:[#allocation11 + $0x24] sm:$0xf0]  ;;  %v1653_v18 = vld [vmem:[#allocation11 + $0x10] sm:$0xf]  ;;  %v1936_v19 = vld [vmem:[#allocation11 + $0x14] sm:$0xf0] }
  0x2a   :  { %v1662_v17 = vor.u32 %v1938_v16, %v1661_v15  ;;  %v1654_v20 = vor.u32 %v1936_v19, %v1653_v18  ;;  %v1645_v21 = vld [vmem:[#allocation11] sm:$0xf]  ;;  %v1934_v22 = vld [vmem:[#allocation11 + $0x4] sm:$0xf0]  ;;  %v1947_v23 = vld [vmem:[#allocation11 + $0x74] sm:$0xf] }
  0x2b   :  { %v1703_v24 = vld [vmem:[#allocation11 + $0x78] sm:$0xf0]  ;;  %v173_v25 = vld [vmem:[#allocation7] sm:$0xff]  ;;  %v1646_v26 = vor.u32 %v1934_v22, %v1645_v21  ;;  %v174_v27 = vld [vmem:[#allocation7 + $0x8] sm:$0xff]  ;;  %s1613_s2 = sshll.u32 %s2956_s13, 4  ;;  %s2580_s13 = smov [#allocation17]   ;;  %s1614_s2 = int_to_ptr.hbm [resolvable:$true] %s1613_s2 }
  0x2c   :  { %300 = vmatpush.bf16.msra.mxu0 %v1694_v5  ;;  %2008 = vmatpush.bf16.msra.mxu1 %v1694_v5  ;;  %v177_v28 = vld [vmem:[#allocation7 + $0x20] sm:$0xff]  ;;  %v178_v29 = vld [vmem:[#allocation7 + $0x28] sm:$0xff]  ;;  %v1706_v30 = vor.u32 %v1947_v23, %v1703_v24  ;;  %v189_v33 = vpack.c.bf16 %v174_v27, %v173_v25  ;;  %v1943_v36 = vld [vmem:[#allocation11 + $0x54] sm:$0xf]  ;;  %s1622_s28 = sshll.u32 %s2580_s13, 4  ;;  %s1624_s5 = sshll.u32 %s2957_s14, 4  ;;  %s1623_s28 = int_to_ptr.vmem [resolvable:$true] %s1622_s28  ;;  %s1625_s5 = int_to_ptr.hbm [resolvable:$true] %s1624_s5 }
  0x2d   :  { %2009 = vmatpush.bf16.msra.mxu2 %v1694_v5  ;;  %2010 = vmatpush.bf16.msra.mxu3 %v1694_v5  ;;  %v1945_v31 = vld [vmem:[#allocation11 + $0x64] sm:$0xf]  ;;  %v1695_v32 = vld [vmem:[#allocation11 + $0x68] sm:$0xf0]  ;;  %v191_v34 = vpack.c.bf16 %v178_v29, %v177_v28  ;;  %v1687_v37 = vld [vmem:[#allocation11 + $0x58] sm:$0xf0] }
  0x2e   :  { %v1698_v35 = vor.u32 %v1945_v31, %v1695_v32  ;;  %v1690_v38 = vor.u32 %v1943_v36, %v1687_v37  ;;  %v1941_v39 = vld [vmem:[#allocation11 + $0x44] sm:$0xf]  ;;  %v1679_v40 = vld [vmem:[#allocation11 + $0x48] sm:$0xf0]  ;;  %v1939_v42 = vld [vmem:[#allocation11 + $0x34] sm:$0xf] }
  0x2f   :  { %v1682_v41 = vor.u32 %v1941_v39, %v1679_v40  ;;  %v1671_v43 = vld [vmem:[#allocation11 + $0x38] sm:$0xf0]  ;;  %v175_v44 = vld [vmem:[#allocation7 + $0x10] sm:$0xff]  ;;  %v1937_v49 = vld [vmem:[#allocation11 + $0x24] sm:$0xf] }
  0x30   :  { %301 = vmatpush.bf16.msra.mxu0 %v1686_v8  ;;  %2011 = vmatpush.bf16.msra.mxu1 %v1686_v8  ;;  %v176_v45 = vld [vmem:[#allocation7 + $0x18] sm:$0xff]  ;;  %v179_v46 = vld [vmem:[#allocation7 + $0x30] sm:$0xff]  ;;  %v1674_v48 = vor.u32 %v1939_v42, %v1671_v43  ;;  %v1663_v50 = vld [vmem:[#allocation11 + $0x28] sm:$0xf0] }
  0x31   :  { %2012 = vmatpush.bf16.msra.mxu2 %v1686_v8  ;;  %2013 = vmatpush.bf16.msra.mxu3 %v1686_v8  ;;  %v180_v47 = vld [vmem:[#allocation7 + $0x38] sm:$0xff]  ;;  %v190_v51 = vpack.c.bf16 %v176_v45, %v175_v44  ;;  %v1666_v53 = vor.u32 %v1937_v49, %v1663_v50  ;;  %v1935_v54 = vld [vmem:[#allocation11 + $0x14] sm:$0xf]  ;;  %v1933_v57 = vld [vmem:[#allocation11 + $0x4] sm:$0xf] }
  0x32   :  { %v192_v52 = vpack.c.bf16 %v180_v47, %v179_v46  ;;  %v1655_v55 = vld [vmem:[#allocation11 + $0x18] sm:$0xf0]  ;;  %v1647_v58 = vld [vmem:[#allocation11 + $0x8] sm:$0xf0]  ;;  %v181_v60 = vld [vmem:[#allocation7 + $0x40] sm:$0xff] }
  0x33   :  { %v1658_v56 = vor.u32 %v1935_v54, %v1655_v55  ;;  %v1650_v59 = vor.u32 %v1933_v57, %v1647_v58  ;;  %v182_v61 = vld [vmem:[#allocation7 + $0x48] sm:$0xff]  ;;  %v183_v63 = vld [vmem:[#allocation7 + $0x50] sm:$0xff]  ;;  %v184_v0 = vld [vmem:[#allocation7 + $0x58] sm:$0xff] }
  0x34   :  { %302 = vmatpush.bf16.msra.mxu0 %v1678_v11  ;;  %2014 = vmatpush.bf16.msra.mxu1 %v1678_v11  ;;  %v193_v62 = vpack.c.bf16 %v182_v61, %v181_v60  ;;  %v194_v1 = vpack.c.bf16 %v184_v0, %v183_v63  ;;  %v185_v2 = vld [vmem:[#allocation7 + $0x60] sm:$0xff]  ;;  %v186_v3 = vld [vmem:[#allocation7 + $0x68] sm:$0xff]  ;;  %v1956_v5 = vld [vmem:[#allocation13 + $0x38] sm:$0xff] }
  0x35   :  { %2015 = vmatpush.bf16.msra.mxu2 %v1678_v11  ;;  %2016 = vmatpush.bf16.msra.mxu3 %v1678_v11  ;;  %v195_v4 = vpack.c.bf16 %v186_v3, %v185_v2  ;;  %v187_v6 = vld [vmem:[#allocation7 + $0x70] sm:$0xff]  ;;  %v188_v7 = vld [vmem:[#allocation7 + $0x78] sm:$0xff]  ;;  %v1954_v10 = vld [vmem:[#allocation13 + $0x28] sm:$0xff] }
  0x36   :  { %v1955_v8 = vld [vmem:[#allocation13 + $0x30] sm:$0xff]  ;;  %v2704_v9 = vpack.c.bf16 %v188_v7, %v187_v6  ;;  %v1953_v11 = vld [vmem:[#allocation13 + $0x20] sm:$0xff]  ;;  %v1952_v12 = vld [vmem:[#allocation13 + $0x18] sm:$0xff] }
  0x37   :  { %v1951_v13 = vld [vmem:[#allocation13 + $0x10] sm:$0xff]  ;;  %v1949_v15 = vld [vmem:[#allocation13] sm:$0xff]  ;;  %v1964_v16 = vld [vmem:[#allocation13 + $0x78] sm:$0xff] }
  0x38   :  { %303 = vmatpush.bf16.msra.mxu0 %v1670_v14  ;;  %2017 = vmatpush.bf16.msra.mxu1 %v1670_v14  ;;  %v1963_v18 = vld [vmem:[#allocation13 + $0x70] sm:$0xff]  ;;  %v1978_v21 = vld [vmem:[#allocation8 + $0x28] sm:$0xff]  ;;  %v213_v22 = vld [vmem:[%s2951_s8] sm:$0x3] }
  0x39   :  { %2018 = vmatpush.bf16.msra.mxu2 %v1670_v14  ;;  %2019 = vmatpush.bf16.msra.mxu3 %v1670_v14  ;;  %v1950_v14 = vld [vmem:[#allocation13 + $0x8] sm:$0xff]  ;;  %v1979_v19 = vld [vmem:[#allocation8 + $0x30] sm:$0xff]  ;;  %v1961_v25 = vld [vmem:[#allocation13 + $0x60] sm:$0xff]  ;;  %v2710_v27 = vperm.slane %v213_v22, 0 }
  0x3a   :  { %v1960_v28 = vld [vmem:[#allocation13 + $0x58] sm:$0xff]  ;;  %v1958_v36 = vld [vmem:[#allocation13 + $0x48] sm:$0xff]  ;;  %v1973_v42 = vld [vmem:[#allocation8] sm:$0xff] }
  0x3b   :  { %v1976_v29 = vld [vmem:[#allocation8 + $0x18] sm:$0xff]  ;;  %v1974_v37 = vld [vmem:[#allocation8 + $0x8] sm:$0xff]  ;;  %v832_v50 = vld [vmem:[#allocation2] sm:$0xff] }
  0x3c   :  { %304 = vmatpush.bf16.msra.mxu0 %v1662_v17  ;;  %2020 = vmatpush.bf16.msra.mxu1 %v1662_v17  ;;  %v1996_v45 = vld [vmem:[#allocation8 + $0x38] sm:$0xff]  ;;  %v834_v0 = vld [vmem:[#allocation2 + $0x10] sm:$0xff] }
  0x3d   :  { %2021 = vmatpush.bf16.msra.mxu2 %v1662_v17  ;;  %2022 = vmatpush.bf16.msra.mxu3 %v1662_v17  ;;  %v1980_v17 = vld [vmem:[#allocation8 + $0x38] sm:$0xff] }
  0x40   :  { %305 = vmatpush.bf16.msra.mxu0 %v1654_v20  ;;  %2023 = vmatpush.bf16.msra.mxu1 %v1654_v20 }
  0x41   :  { %2024 = vmatpush.bf16.msra.mxu2 %v1654_v20  ;;  %2025 = vmatpush.bf16.msra.mxu3 %v1654_v20  ;;  %v1962_v20 = vld [vmem:[#allocation13 + $0x68] sm:$0xff] }
  0x44   :  { %306 = vmatpush.bf16.msra.mxu0 %v1646_v26  ;;  %2026 = vmatpush.bf16.msra.mxu1 %v1646_v26 }
  0x45   :  { %2027 = vmatpush.bf16.msra.mxu2 %v1646_v26  ;;  %2028 = vmatpush.bf16.msra.mxu3 %v1646_v26  ;;  %v1977_v26 = vld [vmem:[#allocation8 + $0x20] sm:$0xff] }
  0x47   :  { %307 = vmatmul.bf16.vlgmr.msra.gmra.mxu0 %v189_v33  ;;  %317 = vmatmul.bf16.vlgmr.msra.gmra.mxu1 %v191_v34 }
  0x48   :  { %348 = vmatpush.bf16.msrb.mxu1 %v1706_v30  ;;  %327 = vmatmul.bf16.vlgmr.msra.gmra.mxu2 %v193_v62 }
  0x49   :  { %337 = vmatmul.bf16.vlgmr.msra.gmra.mxu3 %v195_v4  ;;  %577 = vmatpush.bf16.msrb.mxu2 %v1956_v5 }
  0x4a   :  { %626 = vmatpush.bf16.msrb.mxu3 %v1964_v16 }
  0x4c   :  { %349 = vmatpush.bf16.msrb.mxu1 %v1698_v35 }
  0x4d   :  { %578 = vmatpush.bf16.msrb.mxu2 %v1955_v8 }
  0x4e   :  { %627 = vmatpush.bf16.msrb.mxu3 %v1963_v18  ;;  %v837_v18 = vld [vmem:[#allocation2 + $0x28] sm:$0xff] }
  0x50   :  { %350 = vmatpush.bf16.msrb.mxu1 %v1690_v38 }
  0x51   :  { %579 = vmatpush.bf16.msrb.mxu2 %v1954_v10 }
  0x52   :  { %628 = vmatpush.bf16.msrb.mxu3 %v1962_v20 }
  0x54   :  { %351 = vmatpush.bf16.msrb.mxu1 %v1682_v41  ;;  %v1957_v41 = vld [vmem:[#allocation13 + $0x40] sm:$0xff] }
  0x55   :  { %580 = vmatpush.bf16.msrb.mxu2 %v1953_v11 }
  0x56   :  { %629 = vmatpush.bf16.msrb.mxu3 %v1961_v25 }
  0x57   :  { %312 = vmatmul.bf16.gmra.mxu0 %v190_v51  ;;  %322 = vmatmul.bf16.gmra.mxu1 %v192_v52 }
  0x58   :  { %352 = vmatpush.bf16.msrb.mxu1 %v1674_v48  ;;  %332 = vmatmul.bf16.gmra.mxu2 %v194_v1 }
  0x59   :  { %342 = vmatmul.bf16.gmra.mxu3 %v2704_v9  ;;  %581 = vmatpush.bf16.msrb.mxu2 %v1952_v12  ;;  %v1994_v12 = vld [vmem:[#allocation8 + $0x28] sm:$0xff] }
  0x5a   :  { %630 = vmatpush.bf16.msrb.mxu3 %v1960_v28 }
  0x5c   :  { %353 = vmatpush.bf16.msrb.mxu1 %v1666_v53 }
  0x5d   :  { %582 = vmatpush.bf16.msrb.mxu2 %v1951_v13 }
  0x60   :  { %354 = vmatpush.bf16.msrb.mxu1 %v1658_v56  ;;  %v2717_v56 = vperm.slane %v213_v22, 1 }
  0x61   :  { %583 = vmatpush.bf16.msrb.mxu2 %v1950_v14 }
  0x64   :  { %355 = vmatpush.bf16.msrb.mxu1 %v1650_v59  ;;  %v1995_v59 = vld [vmem:[#allocation8 + $0x30] sm:$0xff] }
  0x65   :  { %584 = vmatpush.bf16.msrb.mxu2 %v1949_v15 }
  0x67   :  { %356 = vmatmul.bf16.vlgmr.msrb.gmra.mxu1 %v189_v33  ;;  %v1959_v33 = vld [vmem:[#allocation13 + $0x50] sm:$0xff] }
  0x68   :  { %924 = vmatpush.bf16.msra.mxu1 %v1980_v17  ;;  %631 = vmatpush.bf16.msrb.mxu3 %v1959_v33  ;;  %v836_v17 = vld [vmem:[#allocation2 + $0x20] sm:$0xff] }
  0x69   :  { %v850_v22 = vpack.c.bf16 %v837_v18, %v836_v17 }
  0x6c   :  { %925 = vmatpush.bf16.msra.mxu1 %v1979_v19  ;;  %632 = vmatpush.bf16.msrb.mxu3 %v1958_v36 }
  0x70   :  { %926 = vmatpush.bf16.msra.mxu1 %v1978_v21  ;;  %633 = vmatpush.bf16.msrb.mxu3 %v1957_v41 }
  0x74   :  { %927 = vmatpush.bf16.msra.mxu1 %v1977_v26  ;;  %1311 = vmatpush.bf16.msra.mxu3 %v1996_v45 }
  0x77   :  { %361 = vmatmul.bf16.gmra.mxu1 %v190_v51  ;;  %v833_v51 = vld [vmem:[#allocation2 + $0x8] sm:$0xff] }
  0x78   :  { %928 = vmatpush.bf16.msra.mxu1 %v1976_v29  ;;  %v848_v53 = vpack.c.bf16 %v833_v51, %v832_v50  ;;  %1312 = vmatpush.bf16.msra.mxu3 %v1995_v59  ;;  %v1992_v50 = vld [vmem:[#allocation8 + $0x18] sm:$0xff] }
  0x7c   :  { %1313 = vmatpush.bf16.msra.mxu3 %v1994_v12 }
  0x87   :  { %366 = vmatmul.bf16.gmra.mxu1 %v191_v34  ;;  %v1975_v34 = vld [vmem:[#allocation8 + $0x10] sm:$0xff] }
  0x88   :  { %929 = vmatpush.bf16.msra.mxu1 %v1975_v34 }
  0x8c   :  { %930 = vmatpush.bf16.msra.mxu1 %v1974_v37  ;;  %v838_v37 = vld [vmem:[#allocation2 + $0x30] sm:$0xff] }
  0x90   :  { %931 = vmatpush.bf16.msra.mxu1 %v1973_v42 }
  0x97   :  { %371 = vmatmul.bf16.gmra.mxu1 %v192_v52 }
  0xa7   :  { %376 = vmatmul.bf16.gmra.mxu1 %v193_v62 }
  0xb7   :  { %381 = vmatmul.bf16.gmra.mxu1 %v194_v1  ;;  %v835_v1 = vld [vmem:[#allocation2 + $0x18] sm:$0xff] }
  0xc4   :  { %v308_v23 = vpop.f32.mrf.mxu0  ;;  %v318_v24 = vpop.f32.mrf.mxu1 }
  0xc5   :  { %v309_v30 = vadd.f32 %v308_v23, %v2710_v27  ;;  %v319_v58 = vadd.f32 %v318_v24, %v2710_v27 }
  0xc7   :  { %386 = vmatmul.bf16.gmra.mxu1 %v195_v4  ;;  %2049 = vtanh.f32 %v309_v30  ;;  %v849_v4 = vpack.c.bf16 %v835_v1, %v834_v0 }
  0xcb   :  { %v328_v10 = vpop.f32.mrf.mxu2 }
  0xcc   :  { %v310_v31 = vpop.f32.mrf.mxu0  ;;  %v320_v32 = vpop.f32.mrf.mxu1  ;;  %v329_v29 = vadd.f32 %v328_v10, %v2710_v27  ;;  %v842_v10 = vld [vmem:[#allocation2 + $0x50] sm:$0xff] }
  0xcd   :  { %v311_v35 = vadd.f32 %v310_v31, %v2710_v27  ;;  %v2050_v38 = vpop.eup %2049  ;;  %v321_v60 = vadd.f32 %v320_v32, %v2710_v27  ;;  %v1993_v31 = vld [vmem:[#allocation8 + $0x20] sm:$0xff] }
  0xce   :  { %1314 = vmatpush.bf16.msra.mxu3 %v1993_v31 }
  0xcf   :  { %2051 = vtanh.f32 %v311_v35 }
  0xd2   :  { %1315 = vmatpush.bf16.msra.mxu3 %v1992_v50  ;;  %v1985_v50 = vld [vmem:[#allocation10 + $0x20] sm:$0xff] }
  0xd3   :  { %v330_v19 = vpop.f32.mrf.mxu2 }
  0xd4   :  { %v313_v39 = vpop.f32.mrf.mxu0  ;;  %v323_v40 = vpop.f32.mrf.mxu1  ;;  %v331_v30 = vadd.f32 %v330_v19, %v2710_v27 }
  0xd5   :  { %v2052_v43 = vpop.eup %2051  ;;  %v314_v46 = vadd.f32 %v313_v39, %v2710_v27  ;;  %v324_v11 = vadd.f32 %v323_v40, %v2710_v27 }
  0xd6   :  { %v429_v44 = vpack.c.bf16 %v2052_v43, %v2050_v38  ;;  %v839_v38 = vld [vmem:[#allocation2 + $0x38] sm:$0xff] }
  0xd7   :  { %391 = vmatmul.bf16.gmra.mxu1 %v2704_v9  ;;  %2053 = vtanh.f32 %v314_v46  ;;  %v851_v40 = vpack.c.bf16 %v839_v38, %v838_v37  ;;  %v1988_v37 = vld [vmem:[#allocation10 + $0x38] sm:$0xff] }
  0xd8   :  { %585 = vmatmul.bf16.vlgmr.msrb.gmra.mxu2 %v429_v44 }
  0xd9   :  { %1065 = vmatpush.bf16.msra.mxu2 %v1988_v37 }
  0xdb   :  { %v333_v33 = vpop.f32.mrf.mxu2 }
  0xdc   :  { %v315_v47 = vpop.f32.mrf.mxu0  ;;  %v325_v48 = vpop.f32.mrf.mxu1 }
  0xdd   :  { %v316_v49 = vadd.f32 %v315_v47, %v2710_v27  ;;  %v2054_v52 = vpop.eup %2053  ;;  %v326_v13 = vadd.f32 %v325_v48, %v2710_v27  ;;  %v334_v47 = vadd.f32 %v333_v33, %v2710_v27  ;;  %v338_v48 = vpop.f32.mrf.mxu3 }
  0xdf   :  { %2055 = vtanh.f32 %v316_v49 }
  0xe0   :  { %2057 = vtanh.f32 %v319_v58 }
  0xe1   :  { %2059 = vtanh.f32 %v321_v60 }
  0xe3   :  { %v335_v44 = vpop.f32.mrf.mxu2 }
  0xe4   :  { %v357_v54 = vpop.f32.mrf.mxu1  ;;  %v336_v49 = vadd.f32 %v335_v44, %v2710_v27  ;;  %v846_v44 = vld [vmem:[#allocation2 + $0x70] sm:$0xff] }
  0xe5   :  { %v2056_v55 = vpop.eup %2055  ;;  %v358_v61 = vadd.f32 %v357_v54, %v2717_v56  ;;  %v340_v58 = vpop.f32.mrf.mxu3 }
  0xe6   :  { %v431_v57 = vpack.c.bf16 %v2056_v55, %v2054_v52  ;;  %v2058_v2 = vpop.eup %2057  ;;  %v840_v55 = vld [vmem:[#allocation2 + $0x40] sm:$0xff] }
  0xe7   :  { %932 = vmatmul.bf16.vlgmr.msra.gmra.mxu1 %v848_v53  ;;  %2061 = vtanh.f32 %v358_v61  ;;  %v2060_v3 = vpop.eup %2059 }
  0xe8   :  { %590 = vmatmul.bf16.gmra.mxu2 %v431_v57  ;;  %v433_v8 = vpack.c.bf16 %v2060_v3, %v2058_v2  ;;  %v841_v57 = vld [vmem:[#allocation2 + $0x48] sm:$0xff]  ;;  %v339_v2 = vadd.f32 %v338_v48, %v2710_v27  ;;  %v341_v3 = vadd.f32 %v340_v58, %v2710_v27  ;;  %v1969_v58 = vld [vmem:[#allocation14 + $0x20] sm:$0xff] }
  0xe9   :  { %v852_v60 = vpack.c.bf16 %v841_v57, %v840_v55 }
  0xec   :  { %v359_v62 = vpop.f32.mrf.mxu1 }
  0xed   :  { %v360_v63 = vadd.f32 %v359_v62, %v2717_v56  ;;  %v2062_v5 = vpop.eup %2061 }
  0xef   :  { %2063 = vtanh.f32 %v360_v63 }
  0xf0   :  { %2065 = vtanh.f32 %v324_v11  ;;  %v843_v11 = vld [vmem:[#allocation2 + $0x58] sm:$0xff] }
  0xf1   :  { %2067 = vtanh.f32 %v326_v13  ;;  %v853_v13 = vpack.c.bf16 %v843_v11, %v842_v10 }
  0xf4   :  { %v362_v6 = vpop.f32.mrf.mxu1 }
  0xf5   :  { %v2064_v7 = vpop.eup %2063  ;;  %v363_v14 = vadd.f32 %v362_v6, %v2717_v56  ;;  %v343_v6 = vpop.f32.mrf.mxu3 }
  0xf6   :  { %v430_v9 = vpack.c.bf16 %v2064_v7, %v2062_v5  ;;  %v2066_v20 = vpop.eup %2065 }
  0xf7   :  { %937 = vmatmul.bf16.gmra.mxu1 %v849_v4  ;;  %2069 = vtanh.f32 %v363_v14  ;;  %v2068_v21 = vpop.eup %2067  ;;  %v1991_v4 = vld [vmem:[#allocation8 + $0x10] sm:$0xff] }
  0xf8   :  { %595 = vmatmul.bf16.gmra.mxu2 %v433_v8  ;;  %634 = vmatmul.bf16.vlgmr.msrb.gmra.mxu3 %v430_v9  ;;  %v435_v26 = vpack.c.bf16 %v2068_v21, %v2066_v20  ;;  %v344_v20 = vadd.f32 %v343_v6, %v2710_v27 }
  0xf9   :  { %1316 = vmatpush.bf16.msra.mxu3 %v1991_v4 }
  0xfc   :  { %v364_v15 = vpop.f32.mrf.mxu1 }
  0xfd   :  { %v365_v16 = vadd.f32 %v364_v15, %v2717_v56  ;;  %v2070_v23 = vpop.eup %2069  ;;  %v345_v17 = vpop.f32.mrf.mxu3 }
  0xfe   :  { %v346_v21 = vadd.f32 %v345_v17, %v2710_v27 }
  0xff   :  { %2071 = vtanh.f32 %v365_v16 }
 0x100   :  { %2073 = vtanh.f32 %v329_v29  ;;  %v845_v29 = vld [vmem:[#allocation2 + $0x68] sm:$0xff] }
 0x101   :  { %2075 = vtanh.f32 %v331_v30 }
 0x104   :  { %v367_v24 = vpop.f32.mrf.mxu1 }
 0x105   :  { %v2072_v25 = vpop.eup %2071  ;;  %v368_v32 = vadd.f32 %v367_v24, %v2717_v56 }
 0x106   :  { %v432_v28 = vpack.c.bf16 %v2072_v25, %v2070_v23  ;;  %v2074_v36 = vpop.eup %2073 }
 0x107   :  { %942 = vmatmul.bf16.gmra.mxu1 %v850_v22  ;;  %2077 = vtanh.f32 %v368_v32  ;;  %v2076_v39 = vpop.eup %2075  ;;  %v1990_v22 = vld [vmem:[#allocation8 + $0x8] sm:$0xff] }
 0x108   :  { %600 = vmatmul.bf16.gmra.mxu2 %v435_v26  ;;  %639 = vmatmul.bf16.gmra.mxu3 %v432_v28  ;;  %v437_v43 = vpack.c.bf16 %v2076_v39, %v2074_v36  ;;  %v844_v28 = vld [vmem:[#allocation2 + $0x60] sm:$0xff] }
 0x109   :  { %1317 = vmatpush.bf16.msra.mxu3 %v1990_v22  ;;  %v854_v31 = vpack.c.bf16 %v845_v29, %v844_v28  ;;  %v1989_v36 = vld [vmem:[#allocation8] sm:$0xff]  ;;  %v2003_v29 = vld [vmem:[#allocation10 + $0x30] sm:$0xff] }
 0x10c   :  { %v369_v34 = vpop.f32.mrf.mxu1 }
 0x10d   :  { %v370_v35 = vadd.f32 %v369_v34, %v2717_v56  ;;  %v2078_v41 = vpop.eup %2077  ;;  %1318 = vmatpush.bf16.msra.mxu3 %v1989_v36 }
 0x10f   :  { %2079 = vtanh.f32 %v370_v35 }
 0x110   :  { %2081 = vtanh.f32 %v334_v47  ;;  %v1971_v47 = vld [vmem:[#allocation14 + $0x30] sm:$0xff] }
 0x111   :  { %2083 = vtanh.f32 %v336_v49 }
 0x114   :  { %v372_v42 = vpop.f32.mrf.mxu1 }
 0x115   :  { %v2080_v45 = vpop.eup %2079  ;;  %v373_v51 = vadd.f32 %v372_v42, %v2717_v56 }
 0x116   :  { %v434_v46 = vpack.c.bf16 %v2080_v45, %v2078_v41  ;;  %v2082_v54 = vpop.eup %2081  ;;  %v1972_v41 = vld [vmem:[#allocation14 + $0x38] sm:$0xff] }
 0x117   :  { %947 = vmatmul.bf16.gmra.mxu1 %v851_v40  ;;  %2085 = vtanh.f32 %v373_v51  ;;  %v2084_v59 = vpop.eup %2083  ;;  %v1987_v40 = vld [vmem:[#allocation10 + $0x30] sm:$0xff]  ;;  %767 = vmatpush.bf16.msrb.mxu0 %v1972_v41  ;;  %v847_v45 = vld [vmem:[#allocation2 + $0x78] sm:$0xff] }
 0x118   :  { %644 = vmatmul.bf16.gmra.mxu3 %v434_v46  ;;  %605 = vmatmul.bf16.gmra.mxu2 %v437_v43  ;;  %v439_v63 = vpack.c.bf16 %v2084_v59, %v2082_v54  ;;  %v1986_v43 = vld [vmem:[#allocation10 + $0x28] sm:$0xff]  ;;  %v855_v46 = vpack.c.bf16 %v847_v45, %v846_v44  ;;  %v1984_v54 = vld [vmem:[#allocation10 + $0x18] sm:$0xff] }
 0x119   :  { %1066 = vmatpush.bf16.msra.mxu2 %v1987_v40 }
 0x11b   :  { %768 = vmatpush.bf16.msrb.mxu0 %v1971_v47 }
 0x11c   :  { %v374_v52 = vpop.f32.mrf.mxu1 }
 0x11d   :  { %v375_v53 = vadd.f32 %v374_v52, %v2717_v56  ;;  %v2086_v61 = vpop.eup %2085  ;;  %1067 = vmatpush.bf16.msra.mxu2 %v1986_v43  ;;  %v1970_v52 = vld [vmem:[#allocation14 + $0x28] sm:$0xff] }
 0x11f   :  { %2087 = vtanh.f32 %v375_v53  ;;  %769 = vmatpush.bf16.msrb.mxu0 %v1970_v52  ;;  %v1223_v52 = vld [vmem:[#allocation5 + $0x20] sm:$0xff] }
 0x120   :  { %2089 = vtanh.f32 %v339_v2 }
 0x121   :  { %2091 = vtanh.f32 %v341_v3  ;;  %1068 = vmatpush.bf16.msra.mxu2 %v1985_v50  ;;  %v2002_v50 = vld [vmem:[#allocation10 + $0x28] sm:$0xff] }
 0x123   :  { %770 = vmatpush.bf16.msrb.mxu0 %v1969_v58 }
 0x124   :  { %v377_v62 = vpop.f32.mrf.mxu1 }
 0x125   :  { %v2088_v0 = vpop.eup %2087  ;;  %v378_v5 = vadd.f32 %v377_v62, %v2717_v56  ;;  %1069 = vmatpush.bf16.msra.mxu2 %v1984_v54  ;;  %v1968_v62 = vld [vmem:[#allocation14 + $0x18] sm:$0xff] }
 0x126   :  { %v436_v1 = vpack.c.bf16 %v2088_v0, %v2086_v61  ;;  %v2090_v9 = vpop.eup %2089  ;;  %v1983_v61 = vld [vmem:[#allocation10 + $0x10] sm:$0xff] }
 0x127   :  { %952 = vmatmul.bf16.gmra.mxu1 %v852_v60  ;;  %2093 = vtanh.f32 %v378_v5  ;;  %v2092_v12 = vpop.eup %2091  ;;  %771 = vmatpush.bf16.msrb.mxu0 %v1968_v62  ;;  %v1967_v0 = vld [vmem:[#allocation14 + $0x10] sm:$0xff]  ;;  %v2750_v5 = vld [vmem:[%s2947_s4] ss:$0 sm:$0xff] }
 0x128   :  { %649 = vmatmul.bf16.gmra.mxu3 %v436_v1  ;;  %610 = vmatmul.bf16.gmra.mxu2 %v439_v63  ;;  %v441_v16 = vpack.c.bf16 %v2092_v12, %v2090_v9  ;;  %v1982_v63 = vld [vmem:[#allocation10 + $0x8] sm:$0xff]  ;;  %v1965_v9 = vld [vmem:[#allocation14] sm:$0xff] }
 0x129   :  { %1070 = vmatpush.bf16.msra.mxu2 %v1983_v61 }
 0x12b   :  { %772 = vmatpush.bf16.msrb.mxu0 %v1967_v0 }
 0x12c   :  { %v379_v7 = vpop.f32.mrf.mxu1 }
 0x12d   :  { %v380_v8 = vadd.f32 %v379_v7, %v2717_v56  ;;  %v2094_v14 = vpop.eup %2093  ;;  %1071 = vmatpush.bf16.msra.mxu2 %v1982_v63  ;;  %v1966_v7 = vld [vmem:[#allocation14 + $0x8] sm:$0xff] }
 0x12f   :  { %2095 = vtanh.f32 %v380_v8  ;;  %773 = vmatpush.bf16.msrb.mxu0 %v1966_v7 }
 0x130   :  { %2097 = vtanh.f32 %v344_v20 }
 0x131   :  { %2099 = vtanh.f32 %v346_v21 }
 0x133   :  { %774 = vmatpush.bf16.msrb.mxu0 %v1965_v9 }
 0x134   :  { %v382_v15 = vpop.f32.mrf.mxu1 }
 0x135   :  { %v2096_v18 = vpop.eup %2095  ;;  %v383_v23 = vadd.f32 %v382_v15, %v2717_v56  ;;  %v1220_v15 = vld [vmem:[#allocation5 + $0x8] sm:$0xff] }
 0x136   :  { %v438_v19 = vpack.c.bf16 %v2096_v18, %v2094_v14  ;;  %v2098_v26 = vpop.eup %2097  ;;  %v1219_v14 = vld [vmem:[#allocation5] sm:$0xff] }
 0x137   :  { %957 = vmatmul.bf16.gmra.mxu1 %v853_v13  ;;  %2101 = vtanh.f32 %v383_v23  ;;  %v2100_v30 = vpop.eup %2099  ;;  %v2004_v13 = vld [vmem:[#allocation10 + $0x38] sm:$0xff]  ;;  %v1235_v17 = vpack.c.bf16 %v1220_v15, %v1219_v14  ;;  %v2758_v23 = vld [vmem:[%s2953_s10] ss:$0 sm:$0xff] }
 0x138   :  { %654 = vmatmul.bf16.gmra.mxu3 %v438_v19  ;;  %615 = vmatmul.bf16.gmra.mxu2 %v441_v16  ;;  %v443_v33 = vpack.c.bf16 %v2100_v30, %v2098_v26 }
 0x139   :  { %1452 = vmatpush.bf16.msra.mxu0 %v2004_v13 }
 0x13c   :  { %v384_v24 = vpop.f32.mrf.mxu1 }
 0x13d   :  { %v385_v25 = vadd.f32 %v384_v24, %v2717_v56  ;;  %v2102_v32 = vpop.eup %2101  ;;  %1453 = vmatpush.bf16.msra.mxu0 %v2003_v29 }
 0x13f   :  { %2103 = vtanh.f32 %v385_v25 }
 0x141   :  { %1454 = vmatpush.bf16.msra.mxu0 %v2002_v50 }
 0x144   :  { %v387_v27 = vpop.f32.mrf.mxu1 }
 0x145   :  { %v2104_v34 = vpop.eup %2103  ;;  %v388_v38 = vadd.f32 %v387_v27, %v2717_v56 }
 0x146   :  { %v440_v35 = vpack.c.bf16 %v2104_v34, %v2102_v32  ;;  %v1222_v32 = vld [vmem:[#allocation5 + $0x18] sm:$0xff] }
 0x147   :  { %962 = vmatmul.bf16.gmra.mxu1 %v854_v31  ;;  %2105 = vtanh.f32 %v388_v38  ;;  %v1221_v31 = vld [vmem:[#allocation5 + $0x10] sm:$0xff] }
 0x148   :  { %659 = vmatmul.bf16.gmra.mxu3 %v440_v35  ;;  %620 = vmatmul.bf16.gmra.mxu2 %v443_v33  ;;  %v1236_v37 = vpack.c.bf16 %v1222_v32, %v1221_v31  ;;  %v2000_v32 = vld [vmem:[#allocation10 + $0x18] sm:$0xff] }
 0x14c   :  { %v389_v39 = vpop.f32.mrf.mxu1 }
 0x14d   :  { %v390_v42 = vadd.f32 %v389_v39, %v2717_v56  ;;  %v2106_v48 = vpop.eup %2105 }
 0x14f   :  { %2107 = vtanh.f32 %v390_v42 }
 0x154   :  { %v392_v49 = vpop.f32.mrf.mxu1 }
 0x155   :  { %v2108_v51 = vpop.eup %2107  ;;  %v393_v55 = vadd.f32 %v392_v49, %v2717_v56 }
 0x156   :  { %v442_v53 = vpack.c.bf16 %v2108_v51, %v2106_v48 }
 0x157   :  { %967 = vmatmul.bf16.gmra.mxu1 %v855_v46  ;;  %2109 = vtanh.f32 %v393_v55 }
 0x158   :  { %664 = vmatmul.bf16.gmra.mxu3 %v442_v53  ;;  %v1224_v53 = vld [vmem:[#allocation5 + $0x28] sm:$0xff] }
 0x15b   :  { %v586_v57 = vpop.f32.mrf.mxu2 }
 0x15c   :  { %v394_v59 = vpop.f32.mrf.mxu1  ;;  %v587_v28 = vadd.f32 %v2758_v23, %v586_v57 }
 0x15d   :  { %v395_v60 = vadd.f32 %v394_v59, %v2717_v56  ;;  %v2110_v1 = vpop.eup %2109  ;;  %v1981_v56 = vld [vmem:[#allocation10] sm:$0xff]  ;;  %v1237_v59 = vpack.c.bf16 %v1224_v53, %v1223_v52  ;;  %v1999_v53 = vld [vmem:[#allocation10 + $0x10] sm:$0xff] }
 0x15e   :  { %1072 = vmatpush.bf16.msra.mxu2 %v1981_v56 }
 0x15f   :  { %2111 = vtanh.f32 %v395_v60 }
 0x163   :  { %v588_v4 = vpop.f32.mrf.mxu2 }
 0x164   :  { %v933_v2 = vpop.f32.mrf.mxu1  ;;  %v589_v27 = vadd.f32 %v2758_v23, %v588_v4 }
 0x165   :  { %v2112_v3 = vpop.eup %2111  ;;  %v934_v8 = vadd.f32 %v2750_v5, %v933_v2 }
 0x166   :  { %v444_v6 = vpack.c.bf16 %v2112_v3, %v2110_v1 }
 0x167   :  { %2113 = vtanh.f32 %v934_v8  ;;  %v2001_v8 = vld [vmem:[#allocation10 + $0x20] sm:$0xff] }
 0x168   :  { %669 = vmatmul.bf16.gmra.mxu3 %v444_v6  ;;  %1455 = vmatpush.bf16.msra.mxu0 %v2001_v8 }
 0x16b   :  { %v591_v12 = vpop.f32.mrf.mxu2 }
 0x16c   :  { %v935_v10 = vpop.f32.mrf.mxu1  ;;  %v592_v49 = vadd.f32 %v2758_v23, %v591_v12  ;;  %v1226_v12 = vld [vmem:[#allocation5 + $0x38] sm:$0xff]  ;;  %1456 = vmatpush.bf16.msra.mxu0 %v2000_v32 }
 0x16d   :  { %v936_v11 = vadd.f32 %v2750_v5, %v935_v10  ;;  %v2114_v16 = vpop.eup %2113 }
 0x16f   :  { %2115 = vtanh.f32 %v936_v11  ;;  %v1225_v11 = vld [vmem:[#allocation5 + $0x30] sm:$0xff] }
 0x170   :  { %1457 = vmatpush.bf16.msra.mxu0 %v1999_v53 }
 0x173   :  { %v593_v21 = vpop.f32.mrf.mxu2 }
 0x174   :  { %v938_v18 = vpop.f32.mrf.mxu1  ;;  %v594_v54 = vadd.f32 %v2758_v23, %v593_v21 }
 0x175   :  { %v2116_v19 = vpop.eup %2115  ;;  %v939_v22 = vadd.f32 %v2750_v5, %v938_v18 }
 0x176   :  { %v989_v20 = vpack.c.bf16 %v2116_v19, %v2114_v16 }
 0x177   :  { %2117 = vtanh.f32 %v939_v22 }
 0x178   :  { %1319 = vmatmul.bf16.vlgmr.msra.gmra.mxu3 %v1235_v17  ;;  %1073 = vmatmul.bf16.vlgmr.msra.gmra.mxu2 %v989_v20  ;;  %v1238_v17 = vpack.c.bf16 %v1226_v12, %v1225_v11  ;;  %v1998_v11 = vld [vmem:[#allocation10 + $0x8] sm:$0xff] }
 0x179   :  { %1458 = vmatpush.bf16.msra.mxu0 %v1998_v11 }
 0x17b   :  { %v635_v24 = vpop.f32.mrf.mxu3  ;;  %v596_v34 = vpop.f32.mrf.mxu2 }
 0x17c   :  { %v940_v25 = vpop.f32.mrf.mxu1  ;;  %v636_v30 = vadd.f32 %v635_v24, %v587_v28  ;;  %v597_v7 = vadd.f32 %v2758_v23, %v596_v34  ;;  %v1228_v34 = vld [vmem:[#allocation5 + $0x48] sm:$0xff] }
 0x17d   :  { %v941_v26 = vadd.f32 %v2750_v5, %v940_v25  ;;  %v2118_v33 = vpop.eup %2117 }
 0x17f   :  { %2119 = vtanh.f32 %v941_v26 }
 0x180   :  { %2121 = vtanh.f32 %v636_v30 }
 0x183   :  { %v637_v35 = vpop.f32.mrf.mxu3  ;;  %v598_v46 = vpop.f32.mrf.mxu2 }
 0x184   :  { %v638_v36 = vadd.f32 %v637_v35, %v589_v27  ;;  %v943_v38 = vpop.f32.mrf.mxu1  ;;  %v599_v13 = vadd.f32 %v2758_v23, %v598_v46 }
 0x185   :  { %v2120_v39 = vpop.eup %2119  ;;  %v944_v41 = vadd.f32 %v2750_v5, %v943_v38 }
 0x186   :  { %2123 = vtanh.f32 %v638_v36  ;;  %v990_v40 = vpack.c.bf16 %v2120_v39, %v2118_v33  ;;  %v2122_v42 = vpop.eup %2121  ;;  %v1227_v33 = vld [vmem:[#allocation5 + $0x40] sm:$0xff] }
 0x187   :  { %2125 = vtanh.f32 %v944_v41 }
 0x188   :  { %1324 = vmatmul.bf16.gmra.mxu3 %v1236_v37  ;;  %1078 = vmatmul.bf16.gmra.mxu2 %v990_v40  ;;  %v1239_v40 = vpack.c.bf16 %v1228_v34, %v1227_v33  ;;  %v1997_v34 = vld [vmem:[#allocation10] sm:$0xff] }
 0x189   :  { %1459 = vmatpush.bf16.msra.mxu0 %v1997_v34 }
 0x18b   :  { %v640_v43 = vpop.f32.mrf.mxu3  ;;  %v601_v63 = vpop.f32.mrf.mxu2 }
 0x18c   :  { %v2124_v44 = vpop.eup %2123  ;;  %v945_v45 = vpop.f32.mrf.mxu1  ;;  %v641_v51 = vadd.f32 %v640_v43, %v592_v49  ;;  %v602_v31 = vadd.f32 %v2758_v23, %v601_v63 }
 0x18d   :  { %v691_v47 = vpack.c.bf16 %v2124_v44, %v2122_v42  ;;  %v946_v48 = vadd.f32 %v2750_v5, %v945_v45  ;;  %v2126_v55 = vpop.eup %2125 }
 0x18f   :  { %775 = vmatmul.bf16.vlgmr.msrb.gmra.mxu0 %v691_v47  ;;  %2127 = vtanh.f32 %v946_v48 }
 0x190   :  { %2129 = vtanh.f32 %v641_v51 }
 0x193   :  { %v642_v57 = vpop.f32.mrf.mxu3  ;;  %v603_v9 = vpop.f32.mrf.mxu2 }
 0x194   :  { %v643_v58 = vadd.f32 %v642_v57, %v594_v54  ;;  %v948_v60 = vpop.f32.mrf.mxu1  ;;  %v604_v35 = vadd.f32 %v2758_v23, %v603_v9  ;;  %v1230_v57 = vld [vmem:[#allocation5 + $0x58] sm:$0xff] }
 0x195   :  { %v2128_v61 = vpop.eup %2127  ;;  %v949_v0 = vadd.f32 %v2750_v5, %v948_v60 }
 0x196   :  { %2131 = vtanh.f32 %v643_v58  ;;  %v991_v62 = vpack.c.bf16 %v2128_v61, %v2126_v55  ;;  %v2130_v1 = vpop.eup %2129  ;;  %v1229_v55 = vld [vmem:[#allocation5 + $0x50] sm:$0xff] }
 0x197   :  { %2133 = vtanh.f32 %v949_v0 }
 0x198   :  { %1329 = vmatmul.bf16.gmra.mxu3 %v1237_v59  ;;  %1083 = vmatmul.bf16.gmra.mxu2 %v991_v62  ;;  %v1240_v62 = vpack.c.bf16 %v1230_v57, %v1229_v55 }
 0x19b   :  { %v645_v2 = vpop.f32.mrf.mxu3  ;;  %v606_v21 = vpop.f32.mrf.mxu2 }
 0x19c   :  { %v2132_v3 = vpop.eup %2131  ;;  %v950_v4 = vpop.f32.mrf.mxu1  ;;  %v646_v10 = vadd.f32 %v645_v2, %v597_v7  ;;  %v607_v52 = vadd.f32 %v2758_v23, %v606_v21 }
 0x19d   :  { %v692_v56 = vpack.c.bf16 %v2132_v3, %v2130_v1  ;;  %v951_v6 = vadd.f32 %v2750_v5, %v950_v4  ;;  %v2134_v14 = vpop.eup %2133 }
 0x19f   :  { %780 = vmatmul.bf16.gmra.mxu0 %v692_v56  ;;  %2135 = vtanh.f32 %v951_v6 }
 0x1a0   :  { %2137 = vtanh.f32 %v646_v10 }
 0x1a3   :  { %v647_v15 = vpop.f32.mrf.mxu3  ;;  %v608_v37 = vpop.f32.mrf.mxu2 }
 0x1a4   :  { %v648_v16 = vadd.f32 %v647_v15, %v599_v13  ;;  %v953_v18 = vpop.f32.mrf.mxu1  ;;  %v609_v58 = vadd.f32 %v2758_v23, %v608_v37  ;;  %v1232_v15 = vld [vmem:[#allocation5 + $0x68] sm:$0xff]  ;;  %v1234_v37 = vld [vmem:[#allocation5 + $0x78] sm:$0xff] }
 0x1a5   :  { %v2136_v19 = vpop.eup %2135  ;;  %v954_v22 = vadd.f32 %v2750_v5, %v953_v18 }
 0x1a6   :  { %2139 = vtanh.f32 %v648_v16  ;;  %v992_v20 = vpack.c.bf16 %v2136_v19, %v2134_v14  ;;  %v2138_v24 = vpop.eup %2137  ;;  %v1231_v14 = vld [vmem:[#allocation5 + $0x60] sm:$0xff] }
 0x1a7   :  { %2141 = vtanh.f32 %v954_v22 }
 0x1a8   :  { %1334 = vmatmul.bf16.gmra.mxu3 %v1238_v17  ;;  %1088 = vmatmul.bf16.gmra.mxu2 %v992_v20  ;;  %v1241_v20 = vpack.c.bf16 %v1232_v15, %v1231_v14 }
 0x1ab   :  { %v650_v25 = vpop.f32.mrf.mxu3  ;;  %v611_v49 = vpop.f32.mrf.mxu2 }
 0x1ac   :  { %v2140_v26 = vpop.eup %2139  ;;  %v955_v28 = vpop.f32.mrf.mxu1  ;;  %v651_v27 = vadd.f32 %v650_v25, %v602_v31  ;;  %v612_v10 = vadd.f32 %v2758_v23, %v611_v49 }
 0x1ad   :  { %v693_v29 = vpack.c.bf16 %v2140_v26, %v2138_v24  ;;  %v956_v30 = vadd.f32 %v2750_v5, %v955_v28  ;;  %v2142_v36 = vpop.eup %2141 }
 0x1af   :  { %785 = vmatmul.bf16.gmra.mxu0 %v693_v29  ;;  %2143 = vtanh.f32 %v956_v30 }
 0x1b0   :  { %2145 = vtanh.f32 %v651_v27 }
 0x1b3   :  { %v652_v38 = vpop.f32.mrf.mxu3  ;;  %v613_v2 = vpop.f32.mrf.mxu2 }
 0x1b4   :  { %v653_v39 = vadd.f32 %v652_v38, %v604_v35  ;;  %v958_v41 = vpop.f32.mrf.mxu1  ;;  %v614_v16 = vadd.f32 %v2758_v23, %v613_v2  ;;  %v2804_v2 = vld [vmem:[%s2955_s12] ss:$0 sm:$0xff] }
 0x1b5   :  { %v2144_v42 = vpop.eup %2143  ;;  %v959_v44 = vadd.f32 %v2750_v5, %v958_v41 }
 0x1b6   :  { %2147 = vtanh.f32 %v653_v39  ;;  %v993_v43 = vpack.c.bf16 %v2144_v42, %v2142_v36  ;;  %v2146_v45 = vpop.eup %2145  ;;  %v1233_v36 = vld [vmem:[#allocation5 + $0x70] sm:$0xff] }
 0x1b7   :  { %2149 = vtanh.f32 %v959_v44  ;;  %v1242_v42 = vpack.c.bf16 %v1234_v37, %v1233_v36 }
 0x1b8   :  { %1339 = vmatmul.bf16.gmra.mxu3 %v1239_v40  ;;  %1093 = vmatmul.bf16.gmra.mxu2 %v993_v43 }
 0x1bb   :  { %v655_v46 = vpop.f32.mrf.mxu3  ;;  %v616_v12 = vpop.f32.mrf.mxu2 }
 0x1bc   :  { %v2148_v47 = vpop.eup %2147  ;;  %v960_v48 = vpop.f32.mrf.mxu1  ;;  %v656_v54 = vadd.f32 %v655_v46, %v607_v52  ;;  %v617_v33 = vadd.f32 %v2758_v23, %v616_v12 }
 0x1bd   :  { %v694_v50 = vpack.c.bf16 %v2148_v47, %v2146_v45  ;;  %v961_v51 = vadd.f32 %v2750_v5, %v960_v48  ;;  %v2150_v59 = vpop.eup %2149 }
 0x1bf   :  { %790 = vmatmul.bf16.gmra.mxu0 %v694_v50  ;;  %2151 = vtanh.f32 %v961_v51 }
 0x1c0   :  { %2153 = vtanh.f32 %v656_v54 }
 0x1c3   :  { %v657_v60 = vpop.f32.mrf.mxu3  ;;  %v618_v28 = vpop.f32.mrf.mxu2 }
 0x1c4   :  { %v658_v61 = vadd.f32 %v657_v60, %v609_v58  ;;  %v963_v63 = vpop.f32.mrf.mxu1  ;;  %v619_v38 = vadd.f32 %v2758_v23, %v618_v28  ;;  %v2792_v60 = vld [vmem:[%s2947_s4] ss:$0 sm:$0xff] }
 0x1c5   :  { %v2152_v0 = vpop.eup %2151  ;;  %v964_v3 = vadd.f32 %v2750_v5, %v963_v63 }
 0x1c6   :  { %2155 = vtanh.f32 %v658_v61  ;;  %v994_v1 = vpack.c.bf16 %v2152_v0, %v2150_v59  ;;  %v2154_v4 = vpop.eup %2153 }
 0x1c7   :  { %2157 = vtanh.f32 %v964_v3 }
 0x1c8   :  { %1344 = vmatmul.bf16.gmra.mxu3 %v1240_v62  ;;  %1098 = vmatmul.bf16.gmra.mxu2 %v994_v1  ;;  %v2799_v1 = vld [vmem:[%s2949_s6] ss:$0 sm:$0xff] }
 0x1cb   :  { %v660_v56 = vpop.f32.mrf.mxu3  ;;  %v621_v44 = vpop.f32.mrf.mxu2 }
 0x1cc   :  { %v2156_v6 = vpop.eup %2155  ;;  %v965_v7 = vpop.f32.mrf.mxu1  ;;  %v661_v13 = vadd.f32 %v660_v56, %v612_v10  ;;  %v622_v49 = vadd.f32 %v2758_v23, %v621_v44 }
 0x1cd   :  { %v695_v8 = vpack.c.bf16 %v2156_v6, %v2154_v4  ;;  %v966_v9 = vadd.f32 %v2750_v5, %v965_v7  ;;  %v2158_v17 = vpop.eup %2157 }
 0x1cf   :  { %795 = vmatmul.bf16.gmra.mxu0 %v695_v8  ;;  %2159 = vtanh.f32 %v966_v9 }
 0x1d0   :  { %2161 = vtanh.f32 %v661_v13 }
 0x1d3   :  { %v662_v18 = vpop.f32.mrf.mxu3  ;;  %v623_v50 = vpop.f32.mrf.mxu2 }
 0x1d4   :  { %v663_v19 = vadd.f32 %v662_v18, %v614_v16  ;;  %v968_v21 = vpop.f32.mrf.mxu1  ;;  %v624_v52 = vadd.f32 %v2758_v23, %v623_v50 }
 0x1d5   :  { %v2160_v22 = vpop.eup %2159  ;;  %v969_v25 = vadd.f32 %v2750_v5, %v968_v21 }
 0x1d6   :  { %2163 = vtanh.f32 %v663_v19  ;;  %v995_v24 = vpack.c.bf16 %v2160_v22, %v2158_v17  ;;  %v2162_v26 = vpop.eup %2161 }
 0x1d7   :  { %2165 = vtanh.f32 %v969_v25 }
 0x1d8   :  { %1349 = vmatmul.bf16.gmra.mxu3 %v1241_v20  ;;  %1103 = vmatmul.bf16.gmra.mxu2 %v995_v24 }
 0x1db   :  { %v665_v29 = vpop.f32.mrf.mxu3 }
 0x1dc   :  { %v2164_v30 = vpop.eup %2163  ;;  %v970_v31 = vpop.f32.mrf.mxu1  ;;  %v666_v35 = vadd.f32 %v665_v29, %v617_v33 }
 0x1dd   :  { %v696_v32 = vpack.c.bf16 %v2164_v30, %v2162_v26  ;;  %v971_v27 = vadd.f32 %v2750_v5, %v970_v31  ;;  %v2166_v39 = vpop.eup %2165 }
 0x1df   :  { %800 = vmatmul.bf16.gmra.mxu0 %v696_v32  ;;  %2167 = vtanh.f32 %v971_v27 }
 0x1e0   :  { %2169 = vtanh.f32 %v666_v35 }
 0x1e3   :  { %v667_v40 = vpop.f32.mrf.mxu3 }
 0x1e4   :  { %v668_v41 = vadd.f32 %v667_v40, %v619_v38 }
 0x1e5   :  { %v2168_v43 = vpop.eup %2167 }
 0x1e6   :  { %2171 = vtanh.f32 %v668_v41  ;;  %v996_v5 = vpack.c.bf16 %v2168_v43, %v2166_v39  ;;  %v2170_v45 = vpop.eup %2169 }
 0x1e8   :  { %1354 = vmatmul.bf16.gmra.mxu3 %v1242_v42  ;;  %1108 = vmatmul.bf16.gmra.mxu2 %v996_v5 }
 0x1eb   :  { %v670_v46 = vpop.f32.mrf.mxu3 }
 0x1ec   :  { %v2172_v47 = vpop.eup %2171  ;;  %v671_v51 = vadd.f32 %v670_v46, %v622_v49 }
 0x1ed   :  { %v697_v48 = vpack.c.bf16 %v2172_v47, %v2170_v45 }
 0x1ee   :  { %2173 = vtanh.f32 %v671_v51 }
 0x1ef   :  { %805 = vmatmul.bf16.gmra.mxu0 %v697_v48 }
 0x1f3   :  { %v672_v53 = vpop.f32.mrf.mxu3 }
 0x1f4   :  { %v673_v54 = vadd.f32 %v672_v53, %v624_v52  ;;  %v2174_v55 = vpop.eup %2173 }
 0x1f6   :  { %2175 = vtanh.f32 %v673_v54 }
 0x1fb   :  { %v1320_v57 = vpop.f32.mrf.mxu3  ;;  %v1074_v58 = vpop.f32.mrf.mxu2 }
 0x1fc   :  { %v2176_v59 = vpop.eup %2175  ;;  %v1321_v62 = vadd.f32 %v2792_v60, %v1320_v57  ;;  %v1075_v3 = vadd.f32 %v2799_v1, %v1074_v58 }
 0x1fd   :  { %v698_v61 = vpack.c.bf16 %v2176_v59, %v2174_v55 }
 0x1fe   :  { %2177 = vtanh.f32 %v1321_v62 }
 0x1ff   :  { %810 = vmatmul.bf16.gmra.mxu0 %v698_v61 }
 0x203   :  { %v1322_v63 = vpop.f32.mrf.mxu3  ;;  %v1076_v0 = vpop.f32.mrf.mxu2 }
 0x204   :  { %v1323_v23 = vadd.f32 %v2792_v60, %v1322_v63  ;;  %v2178_v4 = vpop.eup %2177  ;;  %v1077_v11 = vadd.f32 %v2799_v1, %v1076_v0 }
 0x206   :  { %2179 = vtanh.f32 %v1323_v23 }
 0x207   :  { %2181 = vtanh.f32 %v1075_v3 }
 0x20b   :  { %v1325_v56 = vpop.f32.mrf.mxu3  ;;  %v1079_v6 = vpop.f32.mrf.mxu2 }
 0x20c   :  { %v2180_v7 = vpop.eup %2179  ;;  %v776_v8 = vpop.f32.mrf.mxu0  ;;  %v1326_v12 = vadd.f32 %v2792_v60, %v1325_v56  ;;  %v1080_v21 = vadd.f32 %v2799_v1, %v1079_v6 }
 0x20d   :  { %v777_v9 = vadd.f32 %v2804_v2, %v776_v8  ;;  %v1376_v10 = vpack.c.bf16 %v2180_v7, %v2178_v4  ;;  %v2182_v13 = vpop.eup %2181 }
 0x20f   :  { %2183 = vtanh.f32 %v777_v9  ;;  %1460 = vmatmul.bf16.vlgmr.msra.gmra.mxu0 %v1376_v10 }
 0x210   :  { %2185 = vtanh.f32 %v1077_v11 }
 0x211   :  { %2187 = vtanh.f32 %v1326_v12 }
 0x213   :  { %v1327_v14 = vpop.f32.mrf.mxu3  ;;  %v1081_v15 = vpop.f32.mrf.mxu2 }
 0x214   :  { %v1328_v16 = vadd.f32 %v2792_v60, %v1327_v14  ;;  %v778_v17 = vpop.f32.mrf.mxu0  ;;  %v1082_v33 = vadd.f32 %v2799_v1, %v1081_v15 }
 0x215   :  { %v2811_v18 = vpop.eup %2183  ;;  %v779_v19 = vadd.f32 %v2804_v2, %v778_v17 }
 0x216   :  { %2189 = vtanh.f32 %v1328_v16  ;;  %v1130_v20 = vmul.f32 %v2811_v18, %v2182_v13  ;;  %v2186_v22 = vpop.eup %2185 }
 0x217   :  { %2191 = vtanh.f32 %v779_v19  ;;  %v2188_v24 = vpop.eup %2187 }
 0x218   :  { %1146 = vxpose.xlu0.b32.start [1/16] %v1130_v20, 128  ;;  %2193 = vtanh.f32 %v1080_v21 }
 0x21b   :  { %v1330_v25 = vpop.f32.mrf.mxu3  ;;  %v1084_v26 = vpop.f32.mrf.mxu2 }
 0x21c   :  { %v2190_v28 = vpop.eup %2189  ;;  %v781_v29 = vpop.f32.mrf.mxu0  ;;  %v1331_v34 = vadd.f32 %v2792_v60, %v1330_v25  ;;  %v1085_v43 = vadd.f32 %v2799_v1, %v1084_v26 }
 0x21d   :  { %v2816_v30 = vpop.eup %2191  ;;  %v782_v31 = vadd.f32 %v2804_v2, %v781_v29  ;;  %v1377_v32 = vpack.c.bf16 %v2190_v28, %v2188_v24 }
 0x21e   :  { %v1131_v27 = vmul.f32 %v2816_v30, %v2186_v22  ;;  %v2194_v35 = vpop.eup %2193 }
 0x21f   :  { %2195 = vtanh.f32 %v782_v31  ;;  %1465 = vmatmul.bf16.gmra.mxu0 %v1377_v32 }
 0x220   :  { %1147 = vxpose.xlu0.b32.cont [2/16] %v1131_v27, 128  ;;  %2197 = vtanh.f32 %v1082_v33 }
 0x221   :  { %2199 = vtanh.f32 %v1331_v34 }
 0x223   :  { %v1332_v36 = vpop.f32.mrf.mxu3  ;;  %v1086_v37 = vpop.f32.mrf.mxu2 }
 0x224   :  { %v1333_v38 = vadd.f32 %v2792_v60, %v1332_v36  ;;  %v783_v39 = vpop.f32.mrf.mxu0  ;;  %v1087_v53 = vadd.f32 %v2799_v1, %v1086_v37 }
 0x225   :  { %v2823_v40 = vpop.eup %2195  ;;  %v784_v41 = vadd.f32 %v2804_v2, %v783_v39 }
 0x226   :  { %2201 = vtanh.f32 %v1333_v38  ;;  %v1132_v42 = vmul.f32 %v2823_v40, %v2194_v35  ;;  %v2198_v44 = vpop.eup %2197 }
 0x227   :  { %2203 = vtanh.f32 %v784_v41  ;;  %v2200_v5 = vpop.eup %2199 }
 0x228   :  { %1148 = vxpose.xlu0.b32.cont [3/16] %v1132_v42, 128  ;;  %2205 = vtanh.f32 %v1085_v43 }
 0x22b   :  { %v1335_v45 = vpop.f32.mrf.mxu3  ;;  %v1089_v46 = vpop.f32.mrf.mxu2 }
 0x22c   :  { %v2202_v47 = vpop.eup %2201  ;;  %v786_v48 = vpop.f32.mrf.mxu0  ;;  %v1336_v54 = vadd.f32 %v2792_v60, %v1335_v45  ;;  %v1090_v23 = vadd.f32 %v2799_v1, %v1089_v46 }
 0x22d   :  { %v2828_v49 = vpop.eup %2203  ;;  %v787_v50 = vadd.f32 %v2804_v2, %v786_v48  ;;  %v1378_v51 = vpack.c.bf16 %v2202_v47, %v2200_v5 }
 0x22e   :  { %v1133_v52 = vmul.f32 %v2828_v49, %v2198_v44  ;;  %v2206_v55 = vpop.eup %2205 }
 0x22f   :  { %2207 = vtanh.f32 %v787_v50  ;;  %1470 = vmatmul.bf16.gmra.mxu0 %v1378_v51 }
 0x230   :  { %1149 = vxpose.xlu0.b32.cont [4/16] %v1133_v52, 128  ;;  %2209 = vtanh.f32 %v1087_v53 }
 0x231   :  { %2211 = vtanh.f32 %v1336_v54 }
 0x233   :  { %v1337_v57 = vpop.f32.mrf.mxu3  ;;  %v1091_v58 = vpop.f32.mrf.mxu2 }
 0x234   :  { %v1338_v59 = vadd.f32 %v2792_v60, %v1337_v57  ;;  %v788_v61 = vpop.f32.mrf.mxu0  ;;  %v1092_v13 = vadd.f32 %v2799_v1, %v1091_v58 }
 0x235   :  { %v2835_v62 = vpop.eup %2207  ;;  %v789_v63 = vadd.f32 %v2804_v2, %v788_v61 }
 0x236   :  { %2213 = vtanh.f32 %v1338_v59  ;;  %v1134_v0 = vmul.f32 %v2835_v62, %v2206_v55  ;;  %v2210_v3 = vpop.eup %2209 }
 0x237   :  { %2215 = vtanh.f32 %v789_v63  ;;  %v2212_v4 = vpop.eup %2211 }
 0x238   :  { %1150 = vxpose.xlu0.b32.cont [5/16] %v1134_v0, 128  ;;  %2217 = vtanh.f32 %v1090_v23 }
 0x23b   :  { %v1340_v56 = vpop.f32.mrf.mxu3  ;;  %v1094_v6 = vpop.f32.mrf.mxu2 }
 0x23c   :  { %v2214_v7 = vpop.eup %2213  ;;  %v791_v8 = vpop.f32.mrf.mxu0  ;;  %v1341_v14 = vadd.f32 %v2792_v60, %v1340_v56  ;;  %v1095_v25 = vadd.f32 %v2799_v1, %v1094_v6 }
 0x23d   :  { %v2840_v9 = vpop.eup %2215  ;;  %v792_v10 = vadd.f32 %v2804_v2, %v791_v8  ;;  %v1379_v11 = vpack.c.bf16 %v2214_v7, %v2212_v4 }
 0x23e   :  { %v1135_v12 = vmul.f32 %v2840_v9, %v2210_v3  ;;  %v2218_v15 = vpop.eup %2217 }
 0x23f   :  { %2219 = vtanh.f32 %v792_v10  ;;  %1475 = vmatmul.bf16.gmra.mxu0 %v1379_v11 }
 0x240   :  { %1151 = vxpose.xlu0.b32.cont [6/16] %v1135_v12, 128  ;;  %2221 = vtanh.f32 %v1092_v13 }
 0x241   :  { %2223 = vtanh.f32 %v1341_v14 }
 0x243   :  { %v1342_v16 = vpop.f32.mrf.mxu3  ;;  %v1096_v17 = vpop.f32.mrf.mxu2 }
 0x244   :  { %v1343_v19 = vadd.f32 %v2792_v60, %v1342_v16  ;;  %v793_v20 = vpop.f32.mrf.mxu0  ;;  %v1097_v37 = vadd.f32 %v2799_v1, %v1096_v17 }
 0x245   :  { %v2847_v21 = vpop.eup %2219  ;;  %v794_v22 = vadd.f32 %v2804_v2, %v793_v20 }
 0x246   :  { %2225 = vtanh.f32 %v1343_v19  ;;  %v1136_v24 = vmul.f32 %v2847_v21, %v2218_v15  ;;  %v2222_v26 = vpop.eup %2221 }
 0x247   :  { %2227 = vtanh.f32 %v794_v22  ;;  %v2224_v28 = vpop.eup %2223 }
 0x248   :  { %1152 = vxpose.xlu0.b32.cont [7/16] %v1136_v24, 128  ;;  %2229 = vtanh.f32 %v1095_v25 }
 0x24b   :  { %v1345_v29 = vpop.f32.mrf.mxu3  ;;  %v1099_v27 = vpop.f32.mrf.mxu2 }
 0x24c   :  { %v2226_v31 = vpop.eup %2225  ;;  %v796_v32 = vpop.f32.mrf.mxu0  ;;  %v1346_v38 = vadd.f32 %v2792_v60, %v1345_v29  ;;  %v1100_v47 = vadd.f32 %v2799_v1, %v1099_v27 }
 0x24d   :  { %v2852_v33 = vpop.eup %2227  ;;  %v797_v34 = vadd.f32 %v2804_v2, %v796_v32  ;;  %v1380_v35 = vpack.c.bf16 %v2226_v31, %v2224_v28 }
 0x24e   :  { %v1137_v36 = vmul.f32 %v2852_v33, %v2222_v26  ;;  %v2230_v39 = vpop.eup %2229 }
 0x24f   :  { %2231 = vtanh.f32 %v797_v34  ;;  %1480 = vmatmul.bf16.gmra.mxu0 %v1380_v35 }
 0x250   :  { %1153 = vxpose.xlu0.b32.cont [8/16] %v1137_v36, 128  ;;  %2233 = vtanh.f32 %v1097_v37 }
 0x251   :  { %2235 = vtanh.f32 %v1346_v38 }
 0x253   :  { %v1347_v41 = vpop.f32.mrf.mxu3  ;;  %v1101_v46 = vpop.f32.mrf.mxu2 }
 0x254   :  { %v1348_v42 = vadd.f32 %v2792_v60, %v1347_v41  ;;  %v798_v43 = vpop.f32.mrf.mxu0  ;;  %v1102_v59 = vadd.f32 %v2799_v1, %v1101_v46 }
 0x255   :  { %v2859_v44 = vpop.eup %2231  ;;  %v799_v5 = vadd.f32 %v2804_v2, %v798_v43 }
 0x256   :  { %2237 = vtanh.f32 %v1348_v42  ;;  %v1138_v45 = vmul.f32 %v2859_v44, %v2230_v39  ;;  %v2234_v48 = vpop.eup %2233 }
 0x257   :  { %2239 = vtanh.f32 %v799_v5  ;;  %v2236_v50 = vpop.eup %2235 }
 0x258   :  { %1154 = vxpose.xlu0.b32.cont [9/16] %v1138_v45, 128  ;;  %2241 = vtanh.f32 %v1100_v47 }
 0x25b   :  { %v1350_v51 = vpop.f32.mrf.mxu3  ;;  %v1104_v61 = vpop.f32.mrf.mxu2 }
 0x25c   :  { %v2238_v52 = vpop.eup %2237  ;;  %v801_v53 = vpop.f32.mrf.mxu0  ;;  %v1351_v63 = vadd.f32 %v2792_v60, %v1350_v51  ;;  %v1105_v8 = vadd.f32 %v2799_v1, %v1104_v61 }
 0x25d   :  { %v2864_v54 = vpop.eup %2239  ;;  %v802_v55 = vadd.f32 %v2804_v2, %v801_v53  ;;  %v1381_v57 = vpack.c.bf16 %v2238_v52, %v2236_v50  ;;  %v2900_v52 = vld [vmem:[%s2949_s6] ss:$0 sm:$0xff]  ;;  %s2579_s6 = smov [#allocation16]  }
 0x25e   :  { %v1139_v58 = vmul.f32 %v2864_v54, %v2234_v48  ;;  %v2242_v0 = vpop.eup %2241  ;;  %s1611_s26 = sshll.u32 %s2579_s6, 4  ;;  %s1612_s26 = int_to_ptr.vmem [resolvable:$true] %s1611_s26 }
 0x25f   :  { %2243 = vtanh.f32 %v802_v55  ;;  %1485 = vmatmul.bf16.gmra.mxu0 %v1381_v57 }
 0x260   :  { %1155 = vxpose.xlu0.b32.cont [10/16] %v1139_v58, 128  ;;  %2245 = vtanh.f32 %v1102_v59 }
 0x261   :  { %2247 = vtanh.f32 %v1351_v63 }
 0x263   :  { %v1352_v23 = vpop.f32.mrf.mxu3  ;;  %v1106_v11 = vpop.f32.mrf.mxu2 }
 0x264   :  { %v1353_v3 = vadd.f32 %v2792_v60, %v1352_v23  ;;  %v803_v4 = vpop.f32.mrf.mxu0  ;;  %v1107_v22 = vadd.f32 %v2799_v1, %v1106_v11 }
 0x265   :  { %v2871_v56 = vpop.eup %2243  ;;  %v804_v6 = vadd.f32 %v2804_v2, %v803_v4 }
 0x266   :  { %2249 = vtanh.f32 %v1353_v3  ;;  %v1140_v7 = vmul.f32 %v2871_v56, %v2242_v0  ;;  %v2246_v10 = vpop.eup %2245 }
 0x267   :  { %2251 = vtanh.f32 %v804_v6  ;;  %v2248_v12 = vpop.eup %2247 }
 0x268   :  { %1156 = vxpose.xlu0.b32.cont [11/16] %v1140_v7, 128  ;;  %2253 = vtanh.f32 %v1105_v8 }
 0x26b   :  { %v1355_v13 = vpop.f32.mrf.mxu3  ;;  %v1109_v31 = vpop.f32.mrf.mxu2 }
 0x26c   :  { %v2250_v14 = vpop.eup %2249  ;;  %v806_v15 = vpop.f32.mrf.mxu0  ;;  %v1356_v24 = vadd.f32 %v2792_v60, %v1355_v13  ;;  %v1110_v35 = vadd.f32 %v2799_v1, %v1109_v31 }
 0x26d   :  { %v2876_v16 = vpop.eup %2251  ;;  %v807_v17 = vadd.f32 %v2804_v2, %v806_v15  ;;  %v1382_v19 = vpack.c.bf16 %v2250_v14, %v2248_v12 }
 0x26e   :  { %v1141_v20 = vmul.f32 %v2876_v16, %v2246_v10  ;;  %v2254_v25 = vpop.eup %2253 }
 0x26f   :  { %2255 = vtanh.f32 %v807_v17  ;;  %1490 = vmatmul.bf16.gmra.mxu0 %v1382_v19 }
 0x270   :  { %1157 = vxpose.xlu0.b32.cont [12/16] %v1141_v20, 128  ;;  %2257 = vtanh.f32 %v1107_v22 }
 0x271   :  { %2259 = vtanh.f32 %v1356_v24 }
 0x273   :  { %v1357_v26 = vpop.f32.mrf.mxu3  ;;  %v1111_v5 = vpop.f32.mrf.mxu2 }
 0x274   :  { %v1358_v28 = vadd.f32 %v2792_v60, %v1357_v26  ;;  %v808_v29 = vpop.f32.mrf.mxu0  ;;  %v1112_v45 = vadd.f32 %v2799_v1, %v1111_v5 }
 0x275   :  { %v2883_v32 = vpop.eup %2255  ;;  %v809_v27 = vadd.f32 %v2804_v2, %v808_v29 }
 0x276   :  { %2261 = vtanh.f32 %v1358_v28  ;;  %v1142_v34 = vmul.f32 %v2883_v32, %v2254_v25  ;;  %v2258_v36 = vpop.eup %2257 }
 0x277   :  { %2263 = vtanh.f32 %v809_v27  ;;  %v2260_v37 = vpop.eup %2259 }
 0x278   :  { %1158 = vxpose.xlu0.b32.cont [13/16] %v1142_v34, 128  ;;  %2265 = vtanh.f32 %v1110_v35 }
 0x27c   :  { %v2262_v38 = vpop.eup %2261  ;;  %v811_v39 = vpop.f32.mrf.mxu0 }
 0x27d   :  { %v2888_v60 = vpop.eup %2263  ;;  %v812_v41 = vadd.f32 %v2804_v2, %v811_v39  ;;  %v1383_v42 = vpack.c.bf16 %v2262_v38, %v2260_v37 }
 0x27e   :  { %v1143_v43 = vmul.f32 %v2888_v60, %v2258_v36  ;;  %v2266_v46 = vpop.eup %2265 }
 0x27f   :  { %2267 = vtanh.f32 %v812_v41  ;;  %1495 = vmatmul.bf16.gmra.mxu0 %v1383_v42 }
 0x280   :  { %1159 = vxpose.xlu0.b32.cont [14/16] %v1143_v43, 128  ;;  %2269 = vtanh.f32 %v1112_v45 }
 0x284   :  { %v813_v47 = vpop.f32.mrf.mxu0 }
 0x285   :  { %v2893_v48 = vpop.eup %2267  ;;  %v814_v50 = vadd.f32 %v2804_v2, %v813_v47 }
 0x286   :  { %v1144_v51 = vmul.f32 %v2893_v48, %v2266_v46  ;;  %v2270_v53 = vpop.eup %2269 }
 0x287   :  { %2271 = vtanh.f32 %v814_v50 }
 0x288   :  { %1160 = vxpose.xlu0.b32.cont [15/16] %v1144_v51, 128 }
 0x28c   :  { %v1461_v55 = vpop.f32.mrf.mxu0 }
 0x28d   :  { %v2902_v57 = vpop.eup %2271  ;;  %v1462_v1 = vadd.f32 %v2900_v52, %v1461_v55 }
 0x28e   :  { %v1145_v58 = vmul.f32 %v2902_v57, %v2270_v53 }
 0x28f   :  { %2273 = vtanh.f32 %v1462_v1 }
 0x290   :  { %1161 = vxpose.xlu0.b32.end [16/16] %v1145_v58, 128 }
 0x294   :  { %v1463_v2 = vpop.f32.mrf.mxu0 }
 0x295   :  { %v2274_v59 = vpop.eup %2273  ;;  %v1464_v61 = vadd.f32 %v2900_v52, %v1463_v2 }
 0x296   :  { %v1517_v63 = vmul.f32 %v2274_v59, %v2811_v18 }
 0x297   :  { %2275 = vtanh.f32 %v1464_v61 }
 0x298   :  { %1533 = vxpose.xlu1.b32.start [1/16] %v1517_v63, 128 }
 0x29c   :  { %v1466_v0 = vpop.f32.mrf.mxu0 }
 0x29d   :  { %v2276_v23 = vpop.eup %2275  ;;  %v1467_v3 = vadd.f32 %v2900_v52, %v1466_v0 }
 0x29e   :  { %v1518_v4 = vmul.f32 %v2276_v23, %v2816_v30 }
 0x29f   :  { %2277 = vtanh.f32 %v1467_v3 }
 0x2a0   :  { %1534 = vxpose.xlu1.b32.cont [2/16] %v1518_v4, 128 }
 0x2a4   :  { %v1468_v6 = vpop.f32.mrf.mxu0 }
 0x2a5   :  { %v2278_v7 = vpop.eup %2277  ;;  %v1469_v8 = vadd.f32 %v2900_v52, %v1468_v6 }
 0x2a6   :  { %v1519_v10 = vmul.f32 %v2278_v7, %v2823_v40 }
 0x2a7   :  { %2279 = vtanh.f32 %v1469_v8 }
 0x2a8   :  { %1535 = vxpose.xlu1.b32.cont [3/16] %v1519_v10, 128 }
 0x2ac   :  { %v1471_v11 = vpop.f32.mrf.mxu0 }
 0x2ad   :  { %v2280_v18 = vpop.eup %2279  ;;  %v1472_v12 = vadd.f32 %v2900_v52, %v1471_v11 }
 0x2ae   :  { %v1520_v13 = vmul.f32 %v2280_v18, %v2828_v49 }
 0x2af   :  { %2281 = vtanh.f32 %v1472_v12 }
 0x2b0   :  { %1536 = vxpose.xlu1.b32.cont [4/16] %v1520_v13, 128 }
 0x2b4   :  { %v1473_v14 = vpop.f32.mrf.mxu0 }
 0x2b5   :  { %v2282_v30 = vpop.eup %2281  ;;  %v1474_v15 = vadd.f32 %v2900_v52, %v1473_v14 }
 0x2b6   :  { %v1521_v17 = vmul.f32 %v2282_v30, %v2835_v62 }
 0x2b7   :  { %2283 = vtanh.f32 %v1474_v15 }
 0x2b8   :  { %1537 = vxpose.xlu1.b32.cont [5/16] %v1521_v17, 128 }
 0x2bc   :  { %v1476_v19 = vpop.f32.mrf.mxu0  ;;  %v1162_v40 = vpop.trf.xlu0 }
 0x2bd   :  { %v2284_v20 = vpop.eup %2283  ;;  %v1477_v22 = vadd.f32 %v2900_v52, %v1476_v19 }
 0x2be   :  { %v1522_v24 = vmul.f32 %v2284_v20, %v2840_v9 }
 0x2bf   :  { %2285 = vtanh.f32 %v1477_v22 }
 0x2c0   :  { %1538 = vxpose.xlu1.b32.cont [6/16] %v1522_v24, 128 }
 0x2c4   :  { %v1478_v49 = vpop.f32.mrf.mxu0  ;;  %v1163_v25 = vpop.trf.xlu0 }
 0x2c5   :  { %v2286_v26 = vpop.eup %2285  ;;  %v1479_v28 = vadd.f32 %v2900_v52, %v1478_v49  ;;  %v1178_v29 = vadd.f32 %v1163_v25, %v1162_v40 }
 0x2c6   :  { %v1523_v31 = vmul.f32 %v2286_v26, %v2847_v21 }
 0x2c7   :  { %2287 = vtanh.f32 %v1479_v28 }
 0x2c8   :  { %1539 = vxpose.xlu1.b32.cont [7/16] %v1523_v31, 128 }
 0x2cc   :  { %v1481_v62 = vpop.f32.mrf.mxu0  ;;  %v1164_v27 = vpop.trf.xlu0 }
 0x2cd   :  { %v2288_v34 = vpop.eup %2287  ;;  %v1482_v35 = vadd.f32 %v2900_v52, %v1481_v62  ;;  %v1179_v36 = vadd.f32 %v1178_v29, %v1164_v27 }
 0x2ce   :  { %v1524_v9 = vmul.f32 %v2288_v34, %v2852_v33 }
 0x2cf   :  { %2289 = vtanh.f32 %v1482_v35 }
 0x2d0   :  { %1540 = vxpose.xlu1.b32.cont [8/16] %v1524_v9, 128 }
 0x2d4   :  { %v1483_v37 = vpop.f32.mrf.mxu0  ;;  %v1165_v38 = vpop.trf.xlu0 }
 0x2d5   :  { %v2290_v39 = vpop.eup %2289  ;;  %v1484_v41 = vadd.f32 %v2900_v52, %v1483_v37  ;;  %v1180_v42 = vadd.f32 %v1179_v36, %v1165_v38 }
 0x2d6   :  { %v1525_v21 = vmul.f32 %v2290_v39, %v2859_v44 }
 0x2d7   :  { %2291 = vtanh.f32 %v1484_v41 }
 0x2d8   :  { %1541 = vxpose.xlu1.b32.cont [9/16] %v1525_v21, 128 }
 0x2dc   :  { %v1486_v43 = vpop.f32.mrf.mxu0  ;;  %v1166_v5 = vpop.trf.xlu0 }
 0x2dd   :  { %v2292_v45 = vpop.eup %2291  ;;  %v1487_v46 = vadd.f32 %v2900_v52, %v1486_v43  ;;  %v1181_v47 = vadd.f32 %v1180_v42, %v1166_v5 }
 0x2de   :  { %v1526_v33 = vmul.f32 %v2292_v45, %v2864_v54 }
 0x2df   :  { %2293 = vtanh.f32 %v1487_v46 }
 0x2e0   :  { %1542 = vxpose.xlu1.b32.cont [10/16] %v1526_v33, 128 }
 0x2e4   :  { %v1488_v50 = vpop.f32.mrf.mxu0  ;;  %v1167_v51 = vpop.trf.xlu0 }
 0x2e5   :  { %v2294_v53 = vpop.eup %2293  ;;  %v1489_v55 = vadd.f32 %v2900_v52, %v1488_v50  ;;  %v1182_v14 = vadd.f32 %v1181_v47, %v1167_v51 }
 0x2e6   :  { %v1527_v1 = vmul.f32 %v2294_v53, %v2871_v56 }
 0x2e7   :  { %2295 = vtanh.f32 %v1489_v55 }
 0x2e8   :  { %1543 = vxpose.xlu1.b32.cont [11/16] %v1527_v1, 128 }
 0x2ec   :  { %v1491_v44 = vpop.f32.mrf.mxu0  ;;  %v1168_v58 = vpop.trf.xlu0 }
 0x2ed   :  { %v2296_v2 = vpop.eup %2295  ;;  %v1492_v59 = vadd.f32 %v2900_v52, %v1491_v44  ;;  %v1183_v15 = vadd.f32 %v1182_v14, %v1168_v58 }
 0x2ee   :  { %v1528_v61 = vmul.f32 %v2296_v2, %v2876_v16 }
 0x2ef   :  { %2297 = vtanh.f32 %v1492_v59 }
 0x2f0   :  { %1544 = vxpose.xlu1.b32.cont [12/16] %v1528_v61, 128 }
 0x2f4   :  { %v1493_v54 = vpop.f32.mrf.mxu0  ;;  %v1169_v63 = vpop.trf.xlu0 }
 0x2f5   :  { %v2298_v0 = vpop.eup %2297  ;;  %v1494_v23 = vadd.f32 %v2900_v52, %v1493_v54 }
 0x2f6   :  { %v1529_v3 = vmul.f32 %v2298_v0, %v2883_v32 }
 0x2f7   :  { %2299 = vtanh.f32 %v1494_v23 }
 0x2f8   :  { %1545 = vxpose.xlu1.b32.cont [13/16] %v1529_v3, 128 }
 0x2fc   :  { %v1496_v56 = vpop.f32.mrf.mxu0  ;;  %v1170_v4 = vpop.trf.xlu0 }
 0x2fd   :  { %v2300_v6 = vpop.eup %2299  ;;  %v1497_v7 = vadd.f32 %v2900_v52, %v1496_v56 }
 0x2fe   :  { %v1530_v8 = vmul.f32 %v2300_v6, %v2888_v60  ;;  %v1184_v60 = vadd.f32 %v1183_v15, %v1169_v63 }
 0x2ff   :  { %2301 = vtanh.f32 %v1497_v7 }
 0x300   :  { %1546 = vxpose.xlu1.b32.cont [14/16] %v1530_v8, 128  ;;  %v1185_v19 = vadd.f32 %v1184_v60, %v1170_v4 }
 0x304   :  { %v1498_v16 = vpop.f32.mrf.mxu0  ;;  %v1171_v10 = vpop.trf.xlu0 }
 0x305   :  { %v2302_v11 = vpop.eup %2301  ;;  %v1499_v18 = vadd.f32 %v2900_v52, %v1498_v16  ;;  %v1186_v20 = vadd.f32 %v1185_v19, %v1171_v10 }
 0x306   :  { %v1531_v12 = vmul.f32 %v2302_v11, %v2893_v48 }
 0x307   :  { %2303 = vtanh.f32 %v1499_v18 }
 0x308   :  { %1547 = vxpose.xlu1.b32.cont [15/16] %v1531_v12, 128 }
 0x30c   :  { %v1172_v32 = vpop.trf.xlu0 }
 0x30d   :  { %v2304_v13 = vpop.eup %2303  ;;  %v1187_v22 = vadd.f32 %v1186_v20, %v1172_v32 }
 0x30e   :  { %v1532_v30 = vmul.f32 %v2304_v13, %v2902_v57 }
 0x310   :  { %1548 = vxpose.xlu1.b32.end [16/16] %v1532_v30, 128 }
 0x314   :  { %v1173_v17 = vpop.trf.xlu0 }
 0x315   :  { %v1188_v49 = vadd.f32 %v1187_v22, %v1173_v17 }
 0x31c   :  { %v1174_v40 = vpop.trf.xlu0 }
 0x31d   :  { %v1189_v52 = vadd.f32 %v1188_v49, %v1174_v40 }
 0x324   :  { %v1175_v24 = vpop.trf.xlu0 }
 0x325   :  { %v1190_v48 = vadd.f32 %v1189_v52, %v1175_v24 }
 0x32c   :  { %v1176_v25 = vpop.trf.xlu0 }
 0x32d   :  { %v1191_v26 = vadd.f32 %v1190_v48, %v1176_v25 }
 0x334   :  { %v1177_v28 = vpop.trf.xlu0 }
 0x335   :  { %v1192_v29 = vadd.f32 %v1191_v26, %v1177_v28 }
 0x337   :  { %v1193_v31 = vrot.slane %v1192_v29, 4 }
 0x339   :  { %v1194_v62 = vadd.f32 %v1193_v31, %v1192_v29 }
 0x33b   :  { %v1195_v27 = vrot.slane %v1194_v62, 2 }
 0x33c   :  { %v1549_v57 = vpop.trf.xlu1 }
 0x33d   :  { %v1196_v34 = vadd.f32 %v1195_v27, %v1194_v62 }
 0x33f   :  { %v1197_v35 = vrot.slane %v1196_v34, 1 }
 0x341   :  { %v1198_v36 = vadd.f32 %v1197_v35, %v1196_v34 }
 0x343   :  { %v1867_v9 = vmul.f32 -1.442695, %v1198_v36 }
 0x344   :  { %v1550_v37 = vpop.trf.xlu1 }
 0x345   :  { %v1565_v38 = vadd.f32 %v1550_v37, %v1549_v57  ;;  %2305 = vpow2.f32 %v1867_v9 }
 0x34b   :  { %v2306_v39 = vpop.eup %2305 }
 0x34c   :  { %v1202_v41 = vadd.f32 1.0, %v2306_v39  ;;  %v1551_v42 = vpop.trf.xlu1 }
 0x34d   :  { %v1566_v21 = vadd.f32 %v1565_v38, %v1551_v42 }
 0x34e   :  { %2307 = vrcp.f32 %v1202_v41  ;;  %v1214_v47 = vand.u32 2147483648, %v1202_v41  ;;  %vm1208_vm0 = vweird.f32 %v1202_v41  ;;  %v1212_v50 = vand.u32 2147483647, %v1202_v41 }
 0x350   :  { %v1215_v53 = vor.u32 1.1754944e-38, %v1214_v47  ;;  %vm1213_vm3 = vcmp.eq.f32.partialorder %v1212_v50, 8.507059e+37 }
 0x354   :  { %v2308_v43 = vpop.eup %2307  ;;  %v1552_v5 = vpop.trf.xlu1 }
 0x355   :  { %v1567_v45 = vadd.f32 %v1566_v21, %v1552_v5  ;;  %v1204_v46 = vmul.f32 %v2308_v43, %v1202_v41  ;;  %vm1209_vm1 = vweird.f32 %v2308_v43 }
 0x356   :  { %vm1210_vm2 = vmor %vm1208_vm0, %vm1209_vm1 }
 0x357   :  { %v1205_v33 = vsub.f32 1.0, %v1204_v46 }
 0x359   :  { %v1206_v51 = vmul.f32 %v2308_v43, %v1205_v33 }
 0x35b   :  { %v1207_v55 = vadd.f32 %v2308_v43, %v1206_v51 }
 0x35c   :  { %v1553_v1 = vpop.trf.xlu1 }
 0x35d   :  { %v1568_v44 = vadd.f32 %v1567_v45, %v1553_v1  ;;  %v1211_v58 = vsel %vm1210_vm2, %v2308_v43, %v1207_v55 }
 0x35e   :  { %v1216_v2 = vsel %vm1213_vm3, %v1215_v53, %v1211_v58 }
 0x35f   :  { %1218 = vst [vmem:[#allocation16] sm:$0x1] %v1216_v2 }
 0x360   :  { %1616 = dma.vmem_to_hbm [thread:$0]  %s1612_s26, 16, %s1614_s2, [#allocation4]  }
 0x364   :  { %v1554_v59 = vpop.trf.xlu1 }
 0x365   :  { %v1569_v4 = vadd.f32 %v1568_v44, %v1554_v59 }
 0x36c   :  { %v1555_v61 = vpop.trf.xlu1 }
 0x36d   :  { %v1570_v6 = vadd.f32 %v1569_v4, %v1555_v61 }
 0x374   :  { %v1556_v54 = vpop.trf.xlu1 }
 0x375   :  { %v1571_v8 = vadd.f32 %v1570_v6, %v1556_v54 }
 0x37c   :  { %v1557_v63 = vpop.trf.xlu1 }
 0x37d   :  { %v1572_v16 = vadd.f32 %v1571_v8, %v1557_v63 }
 0x384   :  { %v1558_v0 = vpop.trf.xlu1 }
 0x385   :  { %v1573_v10 = vadd.f32 %v1572_v16, %v1558_v0 }
 0x38c   :  { %v1559_v23 = vpop.trf.xlu1 }
 0x38d   :  { %v1574_v11 = vadd.f32 %v1573_v10, %v1559_v23 }
 0x394   :  { %v1560_v3 = vpop.trf.xlu1 }
 0x395   :  { %v1575_v12 = vadd.f32 %v1574_v11, %v1560_v3 }
 0x39c   :  { %v1561_v56 = vpop.trf.xlu1 }
 0x39d   :  { %v1576_v32 = vadd.f32 %v1575_v12, %v1561_v56 }
 0x3a4   :  { %v1562_v7 = vpop.trf.xlu1 }
 0x3a5   :  { %v1577_v13 = vadd.f32 %v1576_v32, %v1562_v7 }
 0x3ac   :  { %v1563_v18 = vpop.trf.xlu1 }
 0x3ad   :  { %v1578_v14 = vadd.f32 %v1577_v13, %v1563_v18 }
 0x3b4   :  { %v1564_v30 = vpop.trf.xlu1 }
 0x3b5   :  { %v1579_v15 = vadd.f32 %v1578_v14, %v1564_v30 }
 0x3b7   :  { %v1580_v17 = vrot.slane %v1579_v15, 4 }
 0x3b9   :  { %v1581_v60 = vadd.f32 %v1580_v17, %v1579_v15 }
 0x3bb   :  { %v1582_v19 = vrot.slane %v1581_v60, 2 }
 0x3bd   :  { %v1583_v40 = vadd.f32 %v1582_v19, %v1581_v60 }
 0x3bf   :  { %v1584_v20 = vrot.slane %v1583_v40, 1 }
 0x3c1   :  { %v1585_v22 = vadd.f32 %v1584_v20, %v1583_v40 }
 0x3c3   :  { %v1932_v24 = vmul.f32 -1.442695, %v1585_v22 }
 0x3c5   :  { %2309 = vpow2.f32 %v1932_v24 }
 0x3cb   :  { %v2310_v49 = vpop.eup %2309 }
 0x3cc   :  { %v1589_v52 = vadd.f32 1.0, %v2310_v49 }
 0x3ce   :  { %2311 = vrcp.f32 %v1589_v52  ;;  %v1601_v28 = vand.u32 2147483648, %v1589_v52  ;;  %v1599_v31 = vand.u32 2147483647, %v1589_v52  ;;  %vm1595_vm5 = vweird.f32 %v1589_v52 }
 0x3d0   :  { %v1602_v27 = vor.u32 1.1754944e-38, %v1601_v28  ;;  %vm1600_vm7 = vcmp.eq.f32.partialorder %v1599_v31, 8.507059e+37 }
 0x3d4   :  { %v2312_v25 = vpop.eup %2311 }
 0x3d5   :  { %v1591_v48 = vmul.f32 %v2312_v25, %v1589_v52  ;;  %vm1596_vm4 = vweird.f32 %v2312_v25 }
 0x3d6   :  { %vm1597_vm6 = vmor %vm1595_vm5, %vm1596_vm4 }
 0x3d7   :  { %v1592_v26 = vsub.f32 1.0, %v1591_v48 }
 0x3d9   :  { %v1593_v29 = vmul.f32 %v2312_v25, %v1592_v26 }
 0x3db   :  { %v1594_v62 = vadd.f32 %v2312_v25, %v1593_v29 }
 0x3dd   :  { %v1598_v57 = vsel %vm1597_vm6, %v2312_v25, %v1594_v62 }
 0x3de   :  { %v1603_v34 = vsel %vm1600_vm7, %v1602_v27, %v1598_v57 }
 0x3df   :  { %1605 = vst [vmem:[#allocation17] sm:$0x1] %v1603_v34 }
 0x3e0   :  { %1627 = dma.vmem_to_hbm [thread:$0]  %s1623_s28, 16, %s1625_s5, [#allocation18]  }
 0x3e1   :  { %2563 = dma.done.wait [#allocation4], 16  }
 0x3e2   :  { %2564 = vsyncadd [#allocation4], 4294967280 }
 0x3e3   :  { %2565 = dma.done.wait [#allocation18], 16  }
 0x3e4   :  { %2566 = vsyncadd [#allocation18], 4294967280 }
 0x3e5   :  { %1636 = vsyncpa [#allocation3], 1 }
 0x3e6   :  { %1637 = vsyncpa [#allocation6], 1 }
 0x3e7   :  { %1638 = vsyncpa [#allocation9], 1 }
 0x3e8   :  { %1639 = vsyncpa [#allocation12], 1 }
 0x3e9   :  { %1640 = vsyncpa [#allocation15], 1 }
 0x3ea   :  { %1641 = vsyncpa [#allocation4], 1 }
 0x3eb   :  { %1642 = vsyncpa [#allocation18], 1 }

</bundles_post_ra>
